<compile_context>
chip_gen: v7x
topology: tpu7x:2x2x1
jax: 0.10.0
libtpu: 0.0.40
codegen_flags: <defaults>
</compile_context>

<pallas_src>
import functools
import math

import jax
import jax.numpy as jnp
from jax import lax
from jax.experimental import pallas as pl
from jax.experimental.pallas import tpu as pltpu

BN_EPS = 1e-5
_NEG = float(jnp.finfo(jnp.float32).min)


# --------------------------------------------------------------------------------------
# In-kernel helpers
# --------------------------------------------------------------------------------------
def _bn_act(y, gamma, beta):
    """Training-mode BatchNorm1d (biased batch stats over rows) folded to scale/shift,
    followed by the ActiveBen piecewise activation."""
    mean = jnp.mean(y, axis=0, keepdims=True)
    var = jnp.mean((y - mean) ** 2, axis=0, keepdims=True)
    scale = gamma * lax.rsqrt(var + BN_EPS)          # EUP rsqrt
    shift = beta - mean * scale
    z = y * scale + shift
    return jnp.where(z <= -1.0, z + 1.0 / 3.0,
                     jnp.where(z >= 1.0, z - 1.0 / 3.0,
                               z * (z * z + 3.0) / 6.0))


# --------------------------------------------------------------------------------------
# Fused Inception block kernel
# --------------------------------------------------------------------------------------
def _inception_kernel(x_ref, w1_ref, g1_ref, be1_ref,
                      w2_ref, g2_ref, be2_ref,
                      w4_ref, g4_ref, be4_ref,
                      o_ref,
                      s1_ref, xpad_ref, t2pad_ref, t3pad_ref, col_ref,
                      *, N, L, C1, R3, O3, R5, O5, CP):
    """
    x_ref   : (N*L, C_in)                    input, channels on lanes
    w1_ref  : (C_in, C1+R3+R5)               merged 1x1 weights [b1 | b2a | b3a]
    w2_ref  : (3*R3+5*R5, O3+O5)             block-diag im2col weights [b2b ; b3b]
    w4_ref  : (C_in, CP)                     branch-4 1x1 weight
    g*/be*  : (1, C) BN gamma/beta per stage
    o_ref   : (N*L, C1+O3+O5+CP)             concatenated block output
    scratch : s1 (post BN+act of merged 1x1), -inf padded x, zero padded t2/t3,
              assembled im2col operand
    """
    x = x_ref[...]                                                       # (N*L, C_in)

    # ---- stage 1: branches 1 / 2a / 3a share input x -> one merged 1x1 matmul ----
    s1 = jnp.dot(x, w1_ref[...], preferred_element_type=jnp.float32)    # (N*L, C1+R3+R5)
    s1 = _bn_act(s1, g1_ref[...], be1_ref[...])
    s1_ref[...] = s1
    o_ref[:, 0:C1] = s1_ref[:, 0:C1]                                     # branch-1 output

    # ---- branch 4: MaxPool1d(k=3, stride=1, pad=1) + 1x1 conv + BN + act ----
    xpad_ref[...] = jnp.full(xpad_ref.shape, _NEG, jnp.float32)
    pooled_rows = []
    for n in range(N):                                                   # N tiny & static
        base = n * (L + 2)
        xpad_ref[base + 1:base + 1 + L, :] = x[n * L:(n + 1) * L, :]
        win0 = xpad_ref[base + 0:base + 0 + L, :]
        win1 = xpad_ref[base + 1:base + 1 + L, :]
        win2 = xpad_ref[base + 2:base + 2 + L, :]
        pooled_rows.append(jnp.maximum(jnp.maximum(win0, win1), win2))
    pooled = jnp.concatenate(pooled_rows, axis=0)                        # (N*L, C_in)
    p4 = jnp.dot(pooled, w4_ref[...], preferred_element_type=jnp.float32)
    out4 = _bn_act(p4, g4_ref[...], be4_ref[...])
    o_ref[:, C1 + O3 + O5:C1 + O3 + O5 + CP] = out4                      # branch-4 output

    # ---- stage 2: branches 2b (K=3,pad=1) and 3b (K=5,pad=2) as one im2col matmul ----
    t2pad_ref[...] = jnp.zeros(t2pad_ref.shape, jnp.float32)
    t3pad_ref[...] = jnp.zeros(t3pad_ref.shape, jnp.float32)
    for n in range(N):
        t2pad_ref[n * (L + 2) + 1:n * (L + 2) + 1 + L, :] = \
            s1_ref[n * L:(n + 1) * L, C1:C1 + R3]
        t3pad_ref[n * (L + 4) + 2:n * (L + 4) + 2 + L, :] = \
            s1_ref[n * L:(n + 1) * L, C1 + R3:C1 + R3 + R5]
    for n in range(N):
        for k in range(3):                                               # K=3 taps
            col_ref[n * L:(n + 1) * L, k * R3:(k + 1) * R3] = \
                t2pad_ref[n * (L + 2) + k:n * (L + 2) + k + L, :]
        for k in range(5):                                               # K=5 taps
            col_ref[n * L:(n + 1) * L, 3 * R3 + k * R5:3 * R3 + (k + 1) * R5] = \
                t3pad_ref[n * (L + 4) + k:n * (L + 4) + k + L, :]
    s2 = jnp.dot(col_ref[...], w2_ref[...], preferred_element_type=jnp.float32)
    s2 = _bn_act(s2, g2_ref[...], be2_ref[...])                          # (N*L, O3+O5)
    o_ref[:, C1:C1 + O3 + O5] = s2                                       # branches 2 & 3


# --------------------------------------------------------------------------------------
# Wrapper: weight folding + single pallas_call
# --------------------------------------------------------------------------------------
def _prep_params(params):
    def w1x1(p):                                       # (C_out, C_in, 1) -> (C_in, C_out)
        return jnp.transpose(p["w"][:, :, 0], (1, 0)).astype(jnp.float32)

    def wcol(p):                                       # (C_out, C_in, K) -> (K*C_in, C_out)
        w = jnp.transpose(p["w"], (2, 1, 0)).astype(jnp.float32)
        return w.reshape(-1, w.shape[-1])

    # NOTE: conv biases are intentionally NOT used: training-mode BN with batch stats
    #       cancels a per-channel constant bias exactly.
    w1 = jnp.concatenate([w1x1(params["b1"]), w1x1(params["b2a"]), w1x1(params["b3a"])], axis=1)
    g1 = jnp.concatenate([params["b1"]["gamma"], params["b2a"]["gamma"], params["b3a"]["gamma"]])[None, :]
    be1 = jnp.concatenate([params["b1"]["beta"], params["b2a"]["beta"], params["b3a"]["beta"]])[None, :]

    w2b = wcol(params["b2b"])                          # (3*R3, O3)
    w3b = wcol(params["b3b"])                          # (5*R5, O5)
    o3, o5 = w2b.shape[1], w3b.shape[1]
    w2 = jnp.concatenate([
        jnp.concatenate([w2b, jnp.zeros((w2b.shape[0], o5), jnp.float32)], axis=1),
        jnp.concatenate([jnp.zeros((w3b.shape[0], o3), jnp.float32), w3b], axis=1),
    ], axis=0)                                         # block-diagonal (3*R3+5*R5, O3+O5)
    g2 = jnp.concatenate([params["b2b"]["gamma"], params["b3b"]["gamma"]])[None, :]
    be2 = jnp.concatenate([params["b2b"]["beta"], params["b3b"]["beta"]])[None, :]

    w4 = w1x1(params["b4"])
    g4 = params["b4"]["gamma"][None, :].astype(jnp.float32)
    be4 = params["b4"]["beta"][None, :].astype(jnp.float32)
    return w1, g1, be1, w2, g2, be2, w4, g4, be4


def inception_block_1d(x_ncl, params):
    """x_ncl: (N, C_in, L) like PyTorch. Returns (N, out_1x1+out_3x3+out_5x5+out_pool, L)."""
    N, C_in, L = x_ncl.shape
    C1 = params["b1"]["w"].shape[0]
    R3 = params["b2a"]["w"].shape[0]
    O3 = params["b2b"]["w"].shape[0]
    R5 = params["b3a"]["w"].shape[0]
    O5 = params["b3b"]["w"].shape[0]
    CP = params["b4"]["w"].shape[0]
    C_total = C1 + O3 + O5 + CP

    w1, g1, be1, w2, g2, be2, w4, g4, be4 = _prep_params(params)

    # NCL -> (N*L, C_in): channels on the lane dim, rows = batch*length.
    x_flat = jnp.transpose(x_ncl, (0, 2, 1)).reshape(N * L, C_in).astype(jnp.float32)

    kern = functools.partial(_inception_kernel, N=N, L=L,
                             C1=C1, R3=R3, O3=O3, R5=R5, O5=O5, CP=CP)

    def full(shape):
        return pl.BlockSpec(shape, lambda i: (0,) * len(shape))

    operands = (x_flat, w1, g1, be1, w2, g2, be2, w4, g4, be4)
    out_flat = pl.pallas_call(
        kern,
        out_shape=jax.ShapeDtypeStruct((N * L, C_total), jnp.float32),
        grid=(1,),
        in_specs=[full(a.shape) for a in operands],
        out_specs=full((N * L, C_total)),
        scratch_shapes=[
            pltpu.VMEM((N * L, C1 + R3 + R5), jnp.float32),    # stage-1 post BN+act
            pltpu.VMEM((N * (L + 2), C_in), jnp.float32),      # -inf padded x (maxpool)
            pltpu.VMEM((N * (L + 2), R3), jnp.float32),        # zero padded t2
            pltpu.VMEM((N * (L + 4), R5), jnp.float32),        # zero padded t3
            pltpu.VMEM((N * L, 3 * R3 + 5 * R5), jnp.float32), # im2col operand
        ],
    )(*operands)

    return jnp.transpose(out_flat.reshape(N, L, C_total), (0, 2, 1))     # -> NCL


# --------------------------------------------------------------------------------------
# Pure-JAX reference (mirrors the PyTorch module, incl. conv bias) for self-check
# --------------------------------------------------------------------------------------
def _reference_forward(x_ncl, params):
    x = jnp.transpose(x_ncl, (0, 2, 1)).astype(jnp.float32)              # NLC

    def conv_bn_act(h, p, K, pad):
        w = p["w"].astype(jnp.float32)
        b = p["b"].astype(jnp.float32)
        L = h.shape[1]
        hp = jnp.pad(h, ((0, 0), (pad, pad), (0, 0)))
        y = sum(jnp.einsum("nlc,oc->nlo", hp[:, k:k + L, :], w[:, :, k],
                           precision=lax.Precision.HIGHEST) for k in range(K)) + b
        mean = jnp.mean(y, axis=(0, 1), keepdims=True)
        var = jnp.mean((y - mean) ** 2, axis=(0, 1), keepdims=True)
        z = p["gamma"] * (y - mean) / jnp.sqrt(var + BN_EPS) + p["beta"]
        return jnp.where(z <= -1.0, z + 1.0 / 3.0,
                         jnp.where(z >= 1.0, z - 1.0 / 3.0, z * (z * z + 3.0) / 6.0))

    b1 = conv_bn_act(x, params["b1"], 1, 0)
    b2 = conv_bn_act(conv_bn_act(x, params["b2a"], 1, 0), params["b2b"], 3, 1)
    b3 = conv_bn_act(conv_bn_act(x, params["b3a"], 1, 0), params["b3b"], 5, 2)
    L = x.shape[1]
    xp = jnp.pad(x, ((0, 0), (1, 1), (0, 0)), constant_values=_NEG)
    mp = jnp.maximum(jnp.maximum(xp[:, 0:L, :], xp[:, 1:L + 1, :]), xp[:, 2:L + 2, :])
    b4 = conv_bn_act(mp, params["b4"], 1, 0)
    return jnp.transpose(jnp.concatenate([b1, b2, b3, b4], axis=-1), (0, 2, 1))


# --------------------------------------------------------------------------------------
# Deterministic parameter init (Conv1d default uniform bounds; BN gamma=1, beta=0)
# --------------------------------------------------------------------------------------
def init_conv_block(key, c_in, c_out, K):
    kw, kb = jax.random.split(key)
    bound = 1.0 / math.sqrt(c_in * K)
    return dict(
        w=jax.random.uniform(kw, (c_out, c_in, K), jnp.float32, -bound, bound),
        b=jax.random.uniform(kb, (c_out,), jnp.float32, -bound, bound),  # cancelled by BN
        gamma=jnp.ones((c_out,), jnp.float32),
        beta=jnp.zeros((c_out,), jnp.float32),
    )


if __name__ == "__main__":
    key = jax.random.PRNGKey(0)
    N, C_in, L = 2, 8, 16
    out_1x1, red_3x3, out_3x3, red_5x5, out_5x5, out_pool = 8, 4, 8, 4, 8, 8

    ks = jax.random.split(key, 7)
    params = {
        "b1":  init_conv_block(ks[0], C_in, out_1x1, 1),
        "b2a": init_conv_block(ks[1], C_in, red_3x3, 1),
        "b2b": init_conv_block(ks[2], red_3x3, out_3x3, 3),
        "b3a": init_conv_block(ks[3], C_in, red_5x5, 1),
        "b3b": init_conv_block(ks[4], red_5x5, out_5x5, 5),
        "b4":  init_conv_block(ks[5], C_in, out_pool, 1),
    }
    x = jax.random.normal(ks[6], (N, C_in, L), jnp.float32)

    y = jax.jit(inception_block_1d)(x, params)
    y = jax.block_until_ready(y)

    assert y.shape == (N, out_1x1 + out_3x3 + out_5x5 + out_pool, L), y.shape
    assert bool(jnp.all(jnp.isfinite(y)))

    y_ref = _reference_forward(x, params)
    assert bool(jnp.allclose(y, y_ref, atol=1e-3, rtol=1e-3)), \
        float(jnp.max(jnp.abs(y - y_ref)))

    print("KERNEL_OK")
</pallas_src>

<mosaic_0001>
module attributes {stable_mosaic.version = 11 : i64} {
  func.func @_inception_kernel(%arg0: i32, %arg1: memref<32x8xf32, #tpu.memory_space<vmem>>, %arg2: memref<8x16xf32, #tpu.memory_space<vmem>>, %arg3: memref<1x16xf32, #tpu.memory_space<vmem>>, %arg4: memref<1x16xf32, #tpu.memory_space<vmem>>, %arg5: memref<32x16xf32, #tpu.memory_space<vmem>>, %arg6: memref<1x16xf32, #tpu.memory_space<vmem>>, %arg7: memref<1x16xf32, #tpu.memory_space<vmem>>, %arg8: memref<8x8xf32, #tpu.memory_space<vmem>>, %arg9: memref<1x8xf32, #tpu.memory_space<vmem>>, %arg10: memref<1x8xf32, #tpu.memory_space<vmem>>, %arg11: memref<32x32xf32, #tpu.memory_space<vmem>>, %arg12: memref<32x16xf32, #tpu.memory_space<vmem>>, %arg13: memref<36x8xf32, #tpu.memory_space<vmem>>, %arg14: memref<36x4xf32, #tpu.memory_space<vmem>>, %arg15: memref<40x4xf32, #tpu.memory_space<vmem>>, %arg16: memref<32x32xf32, #tpu.memory_space<vmem>>) attributes {dimension_semantics = [#tpu.dimension_semantics<arbitrary>], iteration_bounds = array<i64: 1>, scalar_prefetch = 0 : i64, scratch_operands = 5 : i64, tpu.core_type = #tpu.core_type<tc>, window_params = [{pipeline_mode = #tpu.pipeline_mode<synchronous>, transform_indices = @transform_0, window_bounds = array<i64: 32, 8>}, {pipeline_mode = #tpu.pipeline_mode<synchronous>, transform_indices = @transform_1, window_bounds = array<i64: 8, 16>}, {pipeline_mode = #tpu.pipeline_mode<synchronous>, transform_indices = @transform_2, window_bounds = array<i64: 1, 16>}, {pipeline_mode = #tpu.pipeline_mode<synchronous>, transform_indices = @transform_3, window_bounds = array<i64: 1, 16>}, {pipeline_mode = #tpu.pipeline_mode<synchronous>, transform_indices = @transform_4, window_bounds = array<i64: 32, 16>}, {pipeline_mode = #tpu.pipeline_mode<synchronous>, transform_indices = @transform_5, window_bounds = array<i64: 1, 16>}, {pipeline_mode = #tpu.pipeline_mode<synchronous>, transform_indices = @transform_6, window_bounds = array<i64: 1, 16>}, {pipeline_mode = #tpu.pipeline_mode<synchronous>, transform_indices = @transform_7, window_bounds = array<i64: 8, 8>}, {pipeline_mode = #tpu.pipeline_mode<synchronous>, transform_indices = @transform_8, window_bounds = array<i64: 1, 8>}, {pipeline_mode = #tpu.pipeline_mode<synchronous>, transform_indices = @transform_9, window_bounds = array<i64: 1, 8>}, {pipeline_mode = #tpu.pipeline_mode<synchronous>, transform_indices = @transform_10, window_bounds = array<i64: 32, 32>}]} {
    %c0 = arith.constant 0 : index
    %c0_0 = arith.constant 0 : index
    %0 = vector.load %arg1[%c0, %c0_0] : memref<32x8xf32, #tpu.memory_space<vmem>>, vector<32x8xf32>
    %c0_1 = arith.constant 0 : index
    %c0_2 = arith.constant 0 : index
    %1 = vector.load %arg2[%c0_1, %c0_2] : memref<8x16xf32, #tpu.memory_space<vmem>>, vector<8x16xf32>
    %cst = arith.constant dense<0.000000e+00> : vector<32x16xf32>
    %2 = tpu.matmul %0, %1, %cst {dimension_numbers = #tpu.dot_dimension_numbers<[1], [0], [0], [1], [0, 0, 1, 1], [], []>} : vector<32x8xf32>, vector<8x16xf32>, vector<32x16xf32> -> vector<32x16xf32>
    %c0_3 = arith.constant 0 : index
    %c0_4 = arith.constant 0 : index
    %3 = vector.load %arg3[%c0_3, %c0_4] : memref<1x16xf32, #tpu.memory_space<vmem>>, vector<1x16xf32>
    %c0_5 = arith.constant 0 : index
    %c0_6 = arith.constant 0 : index
    %4 = vector.load %arg4[%c0_5, %c0_6] : memref<1x16xf32, #tpu.memory_space<vmem>>, vector<1x16xf32>
    %cst_7 = arith.constant dense<0.000000e+00> : vector<16xf32>
    %5 = vector.multi_reduction <add>, %2, %cst_7 [0] : vector<32x16xf32> to vector<16xf32>
    %6 = vector.shape_cast %5 : vector<16xf32> to vector<1x16xf32>
    %cst_8 = arith.constant 3.200000e+01 : f32
    %7 = vector.broadcast %cst_8 : f32 to vector<1x16xf32>
    %8 = arith.divf %6, %7 : vector<1x16xf32>
    %9 = vector.broadcast %8 : vector<1x16xf32> to vector<32x16xf32>
    %10 = arith.subf %2, %9 : vector<32x16xf32>
    %11 = arith.mulf %10, %10 : vector<32x16xf32>
    %cst_9 = arith.constant dense<0.000000e+00> : vector<16xf32>
    %12 = vector.multi_reduction <add>, %11, %cst_9 [0] : vector<32x16xf32> to vector<16xf32>
    %13 = vector.shape_cast %12 : vector<16xf32> to vector<1x16xf32>
    %cst_10 = arith.constant 3.200000e+01 : f32
    %14 = vector.broadcast %cst_10 : f32 to vector<1x16xf32>
    %15 = arith.divf %13, %14 : vector<1x16xf32>
    %cst_11 = arith.constant 9.99999974E-6 : f32
    %16 = vector.broadcast %cst_11 : f32 to vector<1x16xf32>
    %17 = arith.addf %15, %16 : vector<1x16xf32>
    %18 = math.rsqrt %17 : vector<1x16xf32>
    %19 = arith.mulf %3, %18 : vector<1x16xf32>
    %20 = arith.mulf %8, %19 : vector<1x16xf32>
    %21 = arith.subf %4, %20 : vector<1x16xf32>
    %22 = vector.broadcast %19 : vector<1x16xf32> to vector<32x16xf32>
    %23 = arith.mulf %2, %22 : vector<32x16xf32>
    %24 = vector.broadcast %21 : vector<1x16xf32> to vector<32x16xf32>
    %25 = arith.addf %23, %24 : vector<32x16xf32>
    %cst_12 = arith.constant -1.000000e+00 : f32
    %26 = vector.broadcast %cst_12 : f32 to vector<32x16xf32>
    %27 = arith.cmpf ole, %25, %26 : vector<32x16xf32>
    %cst_13 = arith.constant 0.333333343 : f32
    %28 = vector.broadcast %cst_13 : f32 to vector<32x16xf32>
    %29 = arith.addf %25, %28 : vector<32x16xf32>
    %cst_14 = arith.constant 1.000000e+00 : f32
    %30 = vector.broadcast %cst_14 : f32 to vector<32x16xf32>
    %31 = arith.cmpf oge, %25, %30 : vector<32x16xf32>
    %cst_15 = arith.constant 0.333333343 : f32
    %32 = vector.broadcast %cst_15 : f32 to vector<32x16xf32>
    %33 = arith.subf %25, %32 : vector<32x16xf32>
    %34 = arith.mulf %25, %25 : vector<32x16xf32>
    %cst_16 = arith.constant 3.000000e+00 : f32
    %35 = vector.broadcast %cst_16 : f32 to vector<32x16xf32>
    %36 = arith.addf %34, %35 : vector<32x16xf32>
    %37 = arith.mulf %25, %36 : vector<32x16xf32>
    %cst_17 = arith.constant 6.000000e+00 : f32
    %38 = vector.broadcast %cst_17 : f32 to vector<32x16xf32>
    %39 = arith.divf %37, %38 : vector<32x16xf32>
    %40 = arith.select %31, %33, %39 : vector<32x16xi1>, vector<32x16xf32>
    %41 = arith.select %27, %29, %40 : vector<32x16xi1>, vector<32x16xf32>
    %c0_18 = arith.constant 0 : index
    %c0_19 = arith.constant 0 : index
    %42 = vector.load %arg12[%c0_18, %c0_19] : memref<32x16xf32, #tpu.memory_space<vmem>>, vector<32x16xf32>
    tpu.vector_store %arg12[%c0_18, %c0_19], %41 {strides = array<i32>} : memref<32x16xf32, #tpu.memory_space<vmem>>, vector<32x16xf32>,
    %c0_20 = arith.constant 0 : index
    %c0_21 = arith.constant 0 : index
    %43 = vector.load %arg12[%c0_20, %c0_21] : memref<32x16xf32, #tpu.memory_space<vmem>>, vector<32x8xf32>
    %c0_22 = arith.constant 0 : index
    %c0_23 = arith.constant 0 : index
    %44 = vector.load %arg11[%c0_22, %c0_23] : memref<32x32xf32, #tpu.memory_space<vmem>>, vector<32x8xf32>
    tpu.vector_store %arg11[%c0_22, %c0_23], %43 {strides = array<i32>} : memref<32x32xf32, #tpu.memory_space<vmem>>, vector<32x8xf32>,
    %cst_24 = arith.constant -3.40282347E+38 : f32
    %45 = vector.broadcast %cst_24 : f32 to vector<36x8xf32>
    %c0_25 = arith.constant 0 : index
    %c0_26 = arith.constant 0 : index
    %46 = vector.load %arg13[%c0_25, %c0_26] : memref<36x8xf32, #tpu.memory_space<vmem>>, vector<36x8xf32>
    tpu.vector_store %arg13[%c0_25, %c0_26], %45 {strides = array<i32>} : memref<36x8xf32, #tpu.memory_space<vmem>>, vector<36x8xf32>,
    %47 = vector.extract_strided_slice %0 {offsets = [0, 0], sizes = [16, 8], strides = [1, 1]} : vector<32x8xf32> to vector<16x8xf32>
    %c1 = arith.constant 1 : index
    %c0_27 = arith.constant 0 : index
    %48 = vector.load %arg13[%c1, %c0_27] : memref<36x8xf32, #tpu.memory_space<vmem>>, vector<16x8xf32>
    tpu.vector_store %arg13[%c1, %c0_27], %47 {strides = array<i32>} : memref<36x8xf32, #tpu.memory_space<vmem>>, vector<16x8xf32>,
    %c0_28 = arith.constant 0 : index
    %c0_29 = arith.constant 0 : index
    %49 = vector.load %arg13[%c0_28, %c0_29] : memref<36x8xf32, #tpu.memory_space<vmem>>, vector<16x8xf32>
    %c1_30 = arith.constant 1 : index
    %c0_31 = arith.constant 0 : index
    %50 = vector.load %arg13[%c1_30, %c0_31] : memref<36x8xf32, #tpu.memory_space<vmem>>, vector<16x8xf32>
    %c2 = arith.constant 2 : index
    %c0_32 = arith.constant 0 : index
    %51 = vector.load %arg13[%c2, %c0_32] : memref<36x8xf32, #tpu.memory_space<vmem>>, vector<16x8xf32>
    %52 = arith.maximumf %49, %50 : vector<16x8xf32>
    %53 = arith.maximumf %52, %51 : vector<16x8xf32>
    %54 = vector.extract_strided_slice %0 {offsets = [16, 0], sizes = [16, 8], strides = [1, 1]} : vector<32x8xf32> to vector<16x8xf32>
    %c19 = arith.constant 19 : index
    %c0_33 = arith.constant 0 : index
    %55 = vector.load %arg13[%c19, %c0_33] : memref<36x8xf32, #tpu.memory_space<vmem>>, vector<16x8xf32>
    tpu.vector_store %arg13[%c19, %c0_33], %54 {strides = array<i32>} : memref<36x8xf32, #tpu.memory_space<vmem>>, vector<16x8xf32>,
    %c18 = arith.constant 18 : index
    %c0_34 = arith.constant 0 : index
    %56 = vector.load %arg13[%c18, %c0_34] : memref<36x8xf32, #tpu.memory_space<vmem>>, vector<16x8xf32>
    %c19_35 = arith.constant 19 : index
    %c0_36 = arith.constant 0 : index
    %57 = vector.load %arg13[%c19_35, %c0_36] : memref<36x8xf32, #tpu.memory_space<vmem>>, vector<16x8xf32>
    %c20 = arith.constant 20 : index
    %c0_37 = arith.constant 0 : index
    %58 = vector.load %arg13[%c20, %c0_37] : memref<36x8xf32, #tpu.memory_space<vmem>>, vector<16x8xf32>
    %59 = arith.maximumf %56, %57 : vector<16x8xf32>
    %60 = arith.maximumf %59, %58 : vector<16x8xf32>
    %61 = tpu.concatenate %53, %60 in 0 : vector<16x8xf32>, vector<16x8xf32> -> vector<32x8xf32>
    %c0_38 = arith.constant 0 : index
    %c0_39 = arith.constant 0 : index
    %62 = vector.load %arg8[%c0_38, %c0_39] : memref<8x8xf32, #tpu.memory_space<vmem>>, vector<8x8xf32>
    %cst_40 = arith.constant dense<0.000000e+00> : vector<32x8xf32>
    %63 = tpu.matmul %61, %62, %cst_40 {dimension_numbers = #tpu.dot_dimension_numbers<[1], [0], [0], [1], [0, 0, 1, 1], [], []>} : vector<32x8xf32>, vector<8x8xf32>, vector<32x8xf32> -> vector<32x8xf32>
    %c0_41 = arith.constant 0 : index
    %c0_42 = arith.constant 0 : index
    %64 = vector.load %arg9[%c0_41, %c0_42] : memref<1x8xf32, #tpu.memory_space<vmem>>, vector<1x8xf32>
    %c0_43 = arith.constant 0 : index
    %c0_44 = arith.constant 0 : index
    %65 = vector.load %arg10[%c0_43, %c0_44] : memref<1x8xf32, #tpu.memory_space<vmem>>, vector<1x8xf32>
    %cst_45 = arith.constant dense<0.000000e+00> : vector<8xf32>
    %66 = vector.multi_reduction <add>, %63, %cst_45 [0] : vector<32x8xf32> to vector<8xf32>
    %67 = vector.shape_cast %66 : vector<8xf32> to vector<1x8xf32>
    %cst_46 = arith.constant 3.200000e+01 : f32
    %68 = vector.broadcast %cst_46 : f32 to vector<1x8xf32>
    %69 = arith.divf %67, %68 : vector<1x8xf32>
    %70 = vector.broadcast %69 : vector<1x8xf32> to vector<32x8xf32>
    %71 = arith.subf %63, %70 : vector<32x8xf32>
    %72 = arith.mulf %71, %71 : vector<32x8xf32>
    %cst_47 = arith.constant dense<0.000000e+00> : vector<8xf32>
    %73 = vector.multi_reduction <add>, %72, %cst_47 [0] : vector<32x8xf32> to vector<8xf32>
    %74 = vector.shape_cast %73 : vector<8xf32> to vector<1x8xf32>
    %cst_48 = arith.constant 3.200000e+01 : f32
    %75 = vector.broadcast %cst_48 : f32 to vector<1x8xf32>
    %76 = arith.divf %74, %75 : vector<1x8xf32>
    %cst_49 = arith.constant 9.99999974E-6 : f32
    %77 = vector.broadcast %cst_49 : f32 to vector<1x8xf32>
    %78 = arith.addf %76, %77 : vector<1x8xf32>
    %79 = math.rsqrt %78 : vector<1x8xf32>
    %80 = arith.mulf %64, %79 : vector<1x8xf32>
    %81 = arith.mulf %69, %80 : vector<1x8xf32>
    %82 = arith.subf %65, %81 : vector<1x8xf32>
    %83 = vector.broadcast %80 : vector<1x8xf32> to vector<32x8xf32>
    %84 = arith.mulf %63, %83 : vector<32x8xf32>
    %85 = vector.broadcast %82 : vector<1x8xf32> to vector<32x8xf32>
    %86 = arith.addf %84, %85 : vector<32x8xf32>
    %cst_50 = arith.constant -1.000000e+00 : f32
    %87 = vector.broadcast %cst_50 : f32 to vector<32x8xf32>
    %88 = arith.cmpf ole, %86, %87 : vector<32x8xf32>
    %cst_51 = arith.constant 0.333333343 : f32
    %89 = vector.broadcast %cst_51 : f32 to vector<32x8xf32>
    %90 = arith.addf %86, %89 : vector<32x8xf32>
    %cst_52 = arith.constant 1.000000e+00 : f32
    %91 = vector.broadcast %cst_52 : f32 to vector<32x8xf32>
    %92 = arith.cmpf oge, %86, %91 : vector<32x8xf32>
    %cst_53 = arith.constant 0.333333343 : f32
    %93 = vector.broadcast %cst_53 : f32 to vector<32x8xf32>
    %94 = arith.subf %86, %93 : vector<32x8xf32>
    %95 = arith.mulf %86, %86 : vector<32x8xf32>
    %cst_54 = arith.constant 3.000000e+00 : f32
    %96 = vector.broadcast %cst_54 : f32 to vector<32x8xf32>
    %97 = arith.addf %95, %96 : vector<32x8xf32>
    %98 = arith.mulf %86, %97 : vector<32x8xf32>
    %cst_55 = arith.constant 6.000000e+00 : f32
    %99 = vector.broadcast %cst_55 : f32 to vector<32x8xf32>
    %100 = arith.divf %98, %99 : vector<32x8xf32>
    %101 = arith.select %92, %94, %100 : vector<32x8xi1>, vector<32x8xf32>
    %102 = arith.select %88, %90, %101 : vector<32x8xi1>, vector<32x8xf32>
    %c0_56 = arith.constant 0 : index
    %c24 = arith.constant 24 : index
    %103 = vector.load %arg11[%c0_56, %c24] : memref<32x32xf32, #tpu.memory_space<vmem>>, vector<32x8xf32>
    tpu.vector_store %arg11[%c0_56, %c24], %102 {strides = array<i32>} : memref<32x32xf32, #tpu.memory_space<vmem>>, vector<32x8xf32>,
    %cst_57 = arith.constant 0.000000e+00 : f32
    %104 = vector.broadcast %cst_57 : f32 to vector<36x4xf32>
    %c0_58 = arith.constant 0 : index
    %c0_59 = arith.constant 0 : index
    %105 = vector.load %arg14[%c0_58, %c0_59] : memref<36x4xf32, #tpu.memory_space<vmem>>, vector<36x4xf32>
    tpu.vector_store %arg14[%c0_58, %c0_59], %104 {strides = array<i32>} : memref<36x4xf32, #tpu.memory_space<vmem>>, vector<36x4xf32>,
    %cst_60 = arith.constant 0.000000e+00 : f32
    %106 = vector.broadcast %cst_60 : f32 to vector<40x4xf32>
    %c0_61 = arith.constant 0 : index
    %c0_62 = arith.constant 0 : index
    %107 = vector.load %arg15[%c0_61, %c0_62] : memref<40x4xf32, #tpu.memory_space<vmem>>, vector<40x4xf32>
    tpu.vector_store %arg15[%c0_61, %c0_62], %106 {strides = array<i32>} : memref<40x4xf32, #tpu.memory_space<vmem>>, vector<40x4xf32>,
    %c0_63 = arith.constant 0 : index
    %c8 = arith.constant 8 : index
    %108 = vector.load %arg12[%c0_63, %c8] : memref<32x16xf32, #tpu.memory_space<vmem>>, vector<16x4xf32>
    %c1_64 = arith.constant 1 : index
    %c0_65 = arith.constant 0 : index
    %109 = vector.load %arg14[%c1_64, %c0_65] : memref<36x4xf32, #tpu.memory_space<vmem>>, vector<16x4xf32>
    tpu.vector_store %arg14[%c1_64, %c0_65], %108 {strides = array<i32>} : memref<36x4xf32, #tpu.memory_space<vmem>>, vector<16x4xf32>,
    %c0_66 = arith.constant 0 : index
    %c12 = arith.constant 12 : index
    %110 = vector.load %arg12[%c0_66, %c12] : memref<32x16xf32, #tpu.memory_space<vmem>>, vector<16x4xf32>
    %c2_67 = arith.constant 2 : index
    %c0_68 = arith.constant 0 : index
    %111 = vector.load %arg15[%c2_67, %c0_68] : memref<40x4xf32, #tpu.memory_space<vmem>>, vector<16x4xf32>
    tpu.vector_store %arg15[%c2_67, %c0_68], %110 {strides = array<i32>} : memref<40x4xf32, #tpu.memory_space<vmem>>, vector<16x4xf32>,
    %c16 = arith.constant 16 : index
    %c8_69 = arith.constant 8 : index
    %112 = vector.load %arg12[%c16, %c8_69] : memref<32x16xf32, #tpu.memory_space<vmem>>, vector<16x4xf32>
    %c19_70 = arith.constant 19 : index
    %c0_71 = arith.constant 0 : index
    %113 = vector.load %arg14[%c19_70, %c0_71] : memref<36x4xf32, #tpu.memory_space<vmem>>, vector<16x4xf32>
    tpu.vector_store %arg14[%c19_70, %c0_71], %112 {strides = array<i32>} : memref<36x4xf32, #tpu.memory_space<vmem>>, vector<16x4xf32>,
    %c16_72 = arith.constant 16 : index
    %c12_73 = arith.constant 12 : index
    %114 = vector.load %arg12[%c16_72, %c12_73] : memref<32x16xf32, #tpu.memory_space<vmem>>, vector<16x4xf32>
    %c22 = arith.constant 22 : index
    %c0_74 = arith.constant 0 : index
    %115 = vector.load %arg15[%c22, %c0_74] : memref<40x4xf32, #tpu.memory_space<vmem>>, vector<16x4xf32>
    tpu.vector_store %arg15[%c22, %c0_74], %114 {strides = array<i32>} : memref<40x4xf32, #tpu.memory_space<vmem>>, vector<16x4xf32>,
    %c0_75 = arith.constant 0 : index
    %c0_76 = arith.constant 0 : index
    %116 = vector.load %arg14[%c0_75, %c0_76] : memref<36x4xf32, #tpu.memory_space<vmem>>, vector<16x4xf32>
    %c0_77 = arith.constant 0 : index
    %c0_78 = arith.constant 0 : index
    %117 = vector.load %arg16[%c0_77, %c0_78] : memref<32x32xf32, #tpu.memory_space<vmem>>, vector<16x4xf32>
    tpu.vector_store %arg16[%c0_77, %c0_78], %116 {strides = array<i32>} : memref<32x32xf32, #tpu.memory_space<vmem>>, vector<16x4xf32>,
    %c1_79 = arith.constant 1 : index
    %c0_80 = arith.constant 0 : index
    %118 = vector.load %arg14[%c1_79, %c0_80] : memref<36x4xf32, #tpu.memory_space<vmem>>, vector<16x4xf32>
    %c0_81 = arith.constant 0 : index
    %c4 = arith.constant 4 : index
    %119 = vector.load %arg16[%c0_81, %c4] : memref<32x32xf32, #tpu.memory_space<vmem>>, vector<16x4xf32>
    tpu.vector_store %arg16[%c0_81, %c4], %118 {strides = array<i32>} : memref<32x32xf32, #tpu.memory_space<vmem>>, vector<16x4xf32>,
    %c2_82 = arith.constant 2 : index
    %c0_83 = arith.constant 0 : index
    %120 = vector.load %arg14[%c2_82, %c0_83] : memref<36x4xf32, #tpu.memory_space<vmem>>, vector<16x4xf32>
    %c0_84 = arith.constant 0 : index
    %c8_85 = arith.constant 8 : index
    %121 = vector.load %arg16[%c0_84, %c8_85] : memref<32x32xf32, #tpu.memory_space<vmem>>, vector<16x4xf32>
    tpu.vector_store %arg16[%c0_84, %c8_85], %120 {strides = array<i32>} : memref<32x32xf32, #tpu.memory_space<vmem>>, vector<16x4xf32>,
    %c0_86 = arith.constant 0 : index
    %c0_87 = arith.constant 0 : index
    %122 = vector.load %arg15[%c0_86, %c0_87] : memref<40x4xf32, #tpu.memory_space<vmem>>, vector<16x4xf32>
    %c0_88 = arith.constant 0 : index
    %c12_89 = arith.constant 12 : index
    %123 = vector.load %arg16[%c0_88, %c12_89] : memref<32x32xf32, #tpu.memory_space<vmem>>, vector<16x4xf32>
    tpu.vector_store %arg16[%c0_88, %c12_89], %122 {strides = array<i32>} : memref<32x32xf32, #tpu.memory_space<vmem>>, vector<16x4xf32>,
    %c1_90 = arith.constant 1 : index
    %c0_91 = arith.constant 0 : index
    %124 = vector.load %arg15[%c1_90, %c0_91] : memref<40x4xf32, #tpu.memory_space<vmem>>, vector<16x4xf32>
    %c0_92 = arith.constant 0 : index
    %c16_93 = arith.constant 16 : index
    %125 = vector.load %arg16[%c0_92, %c16_93] : memref<32x32xf32, #tpu.memory_space<vmem>>, vector<16x4xf32>
    tpu.vector_store %arg16[%c0_92, %c16_93], %124 {strides = array<i32>} : memref<32x32xf32, #tpu.memory_space<vmem>>, vector<16x4xf32>,
    %c2_94 = arith.constant 2 : index
    %c0_95 = arith.constant 0 : index
    %126 = vector.load %arg15[%c2_94, %c0_95] : memref<40x4xf32, #tpu.memory_space<vmem>>, vector<16x4xf32>
    %c0_96 = arith.constant 0 : index
    %c20_97 = arith.constant 20 : index
    %127 = vector.load %arg16[%c0_96, %c20_97] : memref<32x32xf32, #tpu.memory_space<vmem>>, vector<16x4xf32>
    tpu.vector_store %arg16[%c0_96, %c20_97], %126 {strides = array<i32>} : memref<32x32xf32, #tpu.memory_space<vmem>>, vector<16x4xf32>,
    %c3 = arith.constant 3 : index
    %c0_98 = arith.constant 0 : index
    %128 = vector.load %arg15[%c3, %c0_98] : memref<40x4xf32, #tpu.memory_space<vmem>>, vector<16x4xf32>
    %c0_99 = arith.constant 0 : index
    %c24_100 = arith.constant 24 : index
    %129 = vector.load %arg16[%c0_99, %c24_100] : memref<32x32xf32, #tpu.memory_space<vmem>>, vector<16x4xf32>
    tpu.vector_store %arg16[%c0_99, %c24_100], %128 {strides = array<i32>} : memref<32x32xf32, #tpu.memory_space<vmem>>, vector<16x4xf32>,
    %c4_101 = arith.constant 4 : index
    %c0_102 = arith.constant 0 : index
    %130 = vector.load %arg15[%c4_101, %c0_102] : memref<40x4xf32, #tpu.memory_space<vmem>>, vector<16x4xf32>
    %c0_103 = arith.constant 0 : index
    %c28 = arith.constant 28 : index
    %131 = vector.load %arg16[%c0_103, %c28] : memref<32x32xf32, #tpu.memory_space<vmem>>, vector<16x4xf32>
    tpu.vector_store %arg16[%c0_103, %c28], %130 {strides = array<i32>} : memref<32x32xf32, #tpu.memory_space<vmem>>, vector<16x4xf32>,
    %c18_104 = arith.constant 18 : index
    %c0_105 = arith.constant 0 : index
    %132 = vector.load %arg14[%c18_104, %c0_105] : memref<36x4xf32, #tpu.memory_space<vmem>>, vector<16x4xf32>
    %c16_106 = arith.constant 16 : index
    %c0_107 = arith.constant 0 : index
    %133 = vector.load %arg16[%c16_106, %c0_107] : memref<32x32xf32, #tpu.memory_space<vmem>>, vector<16x4xf32>
    tpu.vector_store %arg16[%c16_106, %c0_107], %132 {strides = array<i32>} : memref<32x32xf32, #tpu.memory_space<vmem>>, vector<16x4xf32>,
    %c19_108 = arith.constant 19 : index
    %c0_109 = arith.constant 0 : index
    %134 = vector.load %arg14[%c19_108, %c0_109] : memref<36x4xf32, #tpu.memory_space<vmem>>, vector<16x4xf32>
    %c16_110 = arith.constant 16 : index
    %c4_111 = arith.constant 4 : index
    %135 = vector.load %arg16[%c16_110, %c4_111] : memref<32x32xf32, #tpu.memory_space<vmem>>, vector<16x4xf32>
    tpu.vector_store %arg16[%c16_110, %c4_111], %134 {strides = array<i32>} : memref<32x32xf32, #tpu.memory_space<vmem>>, vector<16x4xf32>,
    %c20_112 = arith.constant 20 : index
    %c0_113 = arith.constant 0 : index
    %136 = vector.load %arg14[%c20_112, %c0_113] : memref<36x4xf32, #tpu.memory_space<vmem>>, vector<16x4xf32>
    %c16_114 = arith.constant 16 : index
    %c8_115 = arith.constant 8 : index
    %137 = vector.load %arg16[%c16_114, %c8_115] : memref<32x32xf32, #tpu.memory_space<vmem>>, vector<16x4xf32>
    tpu.vector_store %arg16[%c16_114, %c8_115], %136 {strides = array<i32>} : memref<32x32xf32, #tpu.memory_space<vmem>>, vector<16x4xf32>,
    %c20_116 = arith.constant 20 : index
    %c0_117 = arith.constant 0 : index
    %138 = vector.load %arg15[%c20_116, %c0_117] : memref<40x4xf32, #tpu.memory_space<vmem>>, vector<16x4xf32>
    %c16_118 = arith.constant 16 : index
    %c12_119 = arith.constant 12 : index
    %139 = vector.load %arg16[%c16_118, %c12_119] : memref<32x32xf32, #tpu.memory_space<vmem>>, vector<16x4xf32>
    tpu.vector_store %arg16[%c16_118, %c12_119], %138 {strides = array<i32>} : memref<32x32xf32, #tpu.memory_space<vmem>>, vector<16x4xf32>,
    %c21 = arith.constant 21 : index
    %c0_120 = arith.constant 0 : index
    %140 = vector.load %arg15[%c21, %c0_120] : memref<40x4xf32, #tpu.memory_space<vmem>>, vector<16x4xf32>
    %c16_121 = arith.constant 16 : index
    %c16_122 = arith.constant 16 : index
    %141 = vector.load %arg16[%c16_121, %c16_122] : memref<32x32xf32, #tpu.memory_space<vmem>>, vector<16x4xf32>
    tpu.vector_store %arg16[%c16_121, %c16_122], %140 {strides = array<i32>} : memref<32x32xf32, #tpu.memory_space<vmem>>, vector<16x4xf32>,
    %c22_123 = arith.constant 22 : index
    %c0_124 = arith.constant 0 : index
    %142 = vector.load %arg15[%c22_123, %c0_124] : memref<40x4xf32, #tpu.memory_space<vmem>>, vector<16x4xf32>
    %c16_125 = arith.constant 16 : index
    %c20_126 = arith.constant 20 : index
    %143 = vector.load %arg16[%c16_125, %c20_126] : memref<32x32xf32, #tpu.memory_space<vmem>>, vector<16x4xf32>
    tpu.vector_store %arg16[%c16_125, %c20_126], %142 {strides = array<i32>} : memref<32x32xf32, #tpu.memory_space<vmem>>, vector<16x4xf32>,
    %c23 = arith.constant 23 : index
    %c0_127 = arith.constant 0 : index
    %144 = vector.load %arg15[%c23, %c0_127] : memref<40x4xf32, #tpu.memory_space<vmem>>, vector<16x4xf32>
    %c16_128 = arith.constant 16 : index
    %c24_129 = arith.constant 24 : index
    %145 = vector.load %arg16[%c16_128, %c24_129] : memref<32x32xf32, #tpu.memory_space<vmem>>, vector<16x4xf32>
    tpu.vector_store %arg16[%c16_128, %c24_129], %144 {strides = array<i32>} : memref<32x32xf32, #tpu.memory_space<vmem>>, vector<16x4xf32>,
    %c24_130 = arith.constant 24 : index
    %c0_131 = arith.constant 0 : index
    %146 = vector.load %arg15[%c24_130, %c0_131] : memref<40x4xf32, #tpu.memory_space<vmem>>, vector<16x4xf32>
    %c16_132 = arith.constant 16 : index
    %c28_133 = arith.constant 28 : index
    %147 = vector.load %arg16[%c16_132, %c28_133] : memref<32x32xf32, #tpu.memory_space<vmem>>, vector<16x4xf32>
    tpu.vector_store %arg16[%c16_132, %c28_133], %146 {strides = array<i32>} : memref<32x32xf32, #tpu.memory_space<vmem>>, vector<16x4xf32>,
    %c0_134 = arith.constant 0 : index
    %c0_135 = arith.constant 0 : index
    %148 = vector.load %arg16[%c0_134, %c0_135] : memref<32x32xf32, #tpu.memory_space<vmem>>, vector<32x32xf32>
    %c0_136 = arith.constant 0 : index
    %c0_137 = arith.constant 0 : index
    %149 = vector.load %arg5[%c0_136, %c0_137] : memref<32x16xf32, #tpu.memory_space<vmem>>, vector<32x16xf32>
    %cst_138 = arith.constant dense<0.000000e+00> : vector<32x16xf32>
    %150 = tpu.matmul %148, %149, %cst_138 {dimension_numbers = #tpu.dot_dimension_numbers<[1], [0], [0], [1], [0, 0, 1, 1], [], []>} : vector<32x32xf32>, vector<32x16xf32>, vector<32x16xf32> -> vector<32x16xf32>
    %c0_139 = arith.constant 0 : index
    %c0_140 = arith.constant 0 : index
    %151 = vector.load %arg6[%c0_139, %c0_140] : memref<1x16xf32, #tpu.memory_space<vmem>>, vector<1x16xf32>
    %c0_141 = arith.constant 0 : index
    %c0_142 = arith.constant 0 : index
    %152 = vector.load %arg7[%c0_141, %c0_142] : memref<1x16xf32, #tpu.memory_space<vmem>>, vector<1x16xf32>
    %cst_143 = arith.constant dense<0.000000e+00> : vector<16xf32>
    %153 = vector.multi_reduction <add>, %150, %cst_143 [0] : vector<32x16xf32> to vector<16xf32>
    %154 = vector.shape_cast %153 : vector<16xf32> to vector<1x16xf32>
    %cst_144 = arith.constant 3.200000e+01 : f32
    %155 = vector.broadcast %cst_144 : f32 to vector<1x16xf32>
    %156 = arith.divf %154, %155 : vector<1x16xf32>
    %157 = vector.broadcast %156 : vector<1x16xf32> to vector<32x16xf32>
    %158 = arith.subf %150, %157 : vector<32x16xf32>
    %159 = arith.mulf %158, %158 : vector<32x16xf32>
    %cst_145 = arith.constant dense<0.000000e+00> : vector<16xf32>
    %160 = vector.multi_reduction <add>, %159, %cst_145 [0] : vector<32x16xf32> to vector<16xf32>
    %161 = vector.shape_cast %160 : vector<16xf32> to vector<1x16xf32>
    %cst_146 = arith.constant 3.200000e+01 : f32
    %162 = vector.broadcast %cst_146 : f32 to vector<1x16xf32>
    %163 = arith.divf %161, %162 : vector<1x16xf32>
    %cst_147 = arith.constant 9.99999974E-6 : f32
    %164 = vector.broadcast %cst_147 : f32 to vector<1x16xf32>
    %165 = arith.addf %163, %164 : vector<1x16xf32>
    %166 = math.rsqrt %165 : vector<1x16xf32>
    %167 = arith.mulf %151, %166 : vector<1x16xf32>
    %168 = arith.mulf %156, %167 : vector<1x16xf32>
    %169 = arith.subf %152, %168 : vector<1x16xf32>
    %170 = vector.broadcast %167 : vector<1x16xf32> to vector<32x16xf32>
    %171 = arith.mulf %150, %170 : vector<32x16xf32>
    %172 = vector.broadcast %169 : vector<1x16xf32> to vector<32x16xf32>
    %173 = arith.addf %171, %172 : vector<32x16xf32>
    %cst_148 = arith.constant -1.000000e+00 : f32
    %174 = vector.broadcast %cst_148 : f32 to vector<32x16xf32>
    %175 = arith.cmpf ole, %173, %174 : vector<32x16xf32>
    %cst_149 = arith.constant 0.333333343 : f32
    %176 = vector.broadcast %cst_149 : f32 to vector<32x16xf32>
    %177 = arith.addf %173, %176 : vector<32x16xf32>
    %cst_150 = arith.constant 1.000000e+00 : f32
    %178 = vector.broadcast %cst_150 : f32 to vector<32x16xf32>
    %179 = arith.cmpf oge, %173, %178 : vector<32x16xf32>
    %cst_151 = arith.constant 0.333333343 : f32
    %180 = vector.broadcast %cst_151 : f32 to vector<32x16xf32>
    %181 = arith.subf %173, %180 : vector<32x16xf32>
    %182 = arith.mulf %173, %173 : vector<32x16xf32>
    %cst_152 = arith.constant 3.000000e+00 : f32
    %183 = vector.broadcast %cst_152 : f32 to vector<32x16xf32>
    %184 = arith.addf %182, %183 : vector<32x16xf32>
    %185 = arith.mulf %173, %184 : vector<32x16xf32>
    %cst_153 = arith.constant 6.000000e+00 : f32
    %186 = vector.broadcast %cst_153 : f32 to vector<32x16xf32>
    %187 = arith.divf %185, %186 : vector<32x16xf32>
    %188 = arith.select %179, %181, %187 : vector<32x16xi1>, vector<32x16xf32>
    %189 = arith.select %175, %177, %188 : vector<32x16xi1>, vector<32x16xf32>
    %c0_154 = arith.constant 0 : index
    %c8_155 = arith.constant 8 : index
    %190 = vector.load %arg11[%c0_154, %c8_155] : memref<32x32xf32, #tpu.memory_space<vmem>>, vector<32x16xf32>
    tpu.vector_store %arg11[%c0_154, %c8_155], %189 {strides = array<i32>} : memref<32x32xf32, #tpu.memory_space<vmem>>, vector<32x16xf32>,
    return
  }
  func.func @transform_0(%arg0: i32) -> (i32, i32) {
    %c0_i32 = arith.constant 0 : i32
    %c0_i32_0 = arith.constant 0 : i32
    %c0_i32_1 = arith.constant 0 : i32
    return %c0_i32, %c0_i32_0 : i32, i32
  }
  func.func @transform_1(%arg0: i32) -> (i32, i32) {
    %c0_i32 = arith.constant 0 : i32
    %c0_i32_0 = arith.constant 0 : i32
    %c0_i32_1 = arith.constant 0 : i32
    return %c0_i32, %c0_i32_0 : i32, i32
  }
  func.func @transform_2(%arg0: i32) -> (i32, i32) {
    %c0_i32 = arith.constant 0 : i32
    %c0_i32_0 = arith.constant 0 : i32
    %c0_i32_1 = arith.constant 0 : i32
    return %c0_i32, %c0_i32_0 : i32, i32
  }
  func.func @transform_3(%arg0: i32) -> (i32, i32) {
    %c0_i32 = arith.constant 0 : i32
    %c0_i32_0 = arith.constant 0 : i32
    %c0_i32_1 = arith.constant 0 : i32
    return %c0_i32, %c0_i32_0 : i32, i32
  }
  func.func @transform_4(%arg0: i32) -> (i32, i32) {
    %c0_i32 = arith.constant 0 : i32
    %c0_i32_0 = arith.constant 0 : i32
    %c0_i32_1 = arith.constant 0 : i32
    return %c0_i32, %c0_i32_0 : i32, i32
  }
  func.func @transform_5(%arg0: i32) -> (i32, i32) {
    %c0_i32 = arith.constant 0 : i32
    %c0_i32_0 = arith.constant 0 : i32
    %c0_i32_1 = arith.constant 0 : i32
    return %c0_i32, %c0_i32_0 : i32, i32
  }
  func.func @transform_6(%arg0: i32) -> (i32, i32) {
    %c0_i32 = arith.constant 0 : i32
    %c0_i32_0 = arith.constant 0 : i32
    %c0_i32_1 = arith.constant 0 : i32
    return %c0_i32, %c0_i32_0 : i32, i32
  }
  func.func @transform_7(%arg0: i32) -> (i32, i32) {
    %c0_i32 = arith.constant 0 : i32
    %c0_i32_0 = arith.constant 0 : i32
    %c0_i32_1 = arith.constant 0 : i32
    return %c0_i32, %c0_i32_0 : i32, i32
  }
  func.func @transform_8(%arg0: i32) -> (i32, i32) {
    %c0_i32 = arith.constant 0 : i32
    %c0_i32_0 = arith.constant 0 : i32
    %c0_i32_1 = arith.constant 0 : i32
    return %c0_i32, %c0_i32_0 : i32, i32
  }
  func.func @transform_9(%arg0: i32) -> (i32, i32) {
    %c0_i32 = arith.constant 0 : i32
    %c0_i32_0 = arith.constant 0 : i32
    %c0_i32_1 = arith.constant 0 : i32
    return %c0_i32, %c0_i32_0 : i32, i32
  }
  func.func @transform_10(%arg0: i32) -> (i32, i32) {
    %c0_i32 = arith.constant 0 : i32
    %c0_i32_0 = arith.constant 0 : i32
    %c0_i32_1 = arith.constant 0 : i32
    return %c0_i32, %c0_i32_0 : i32, i32
  }
}

</mosaic_0001>

<bundles_post_ra>
// kernel: inception_block_1d.1
= control target key start
LH: loop header
LB: loop body
LE: loop exit
PB: predicated region body
PF: predicated region fallthrough
CT: control target
= control target key end

     0   :  { %vm41_vm0 = vcmask 64512   ;;  %v1125_v3 = vmov -3.4028235e+38   ;;  %vm261_vm1 = vcmask 60416   ;;  %s1432_s0 = inlined_call_operand.vmem [shape: f32[32,8], index: 0, kind: input, shape index: {}]   ;;  %s1433_s1 = inlined_call_operand.vmem [shape: f32[8,16], index: 1, kind: input, shape index: {}]   ;;  %s1434_s2 = inlined_call_operand.vmem [shape: f32[1,16], index: 2, kind: input, shape index: {}]   ;;  %s1435_s3 = inlined_call_operand.vmem [shape: f32[1,16], index: 3, kind: input, shape index: {}]   ;;  %s1436_s4 = inlined_call_operand.vmem [shape: f32[32,16], index: 4, kind: input, shape index: {}]   ;;  %s1437_s5 = inlined_call_operand.vmem [shape: f32[1,16], index: 5, kind: input, shape index: {}]   ;;  %s1438_s6 = inlined_call_operand.vmem [shape: f32[1,16], index: 6, kind: input, shape index: {}]   ;;  %s1439_s7 = inlined_call_operand.vmem [shape: f32[8,8], index: 7, kind: input, shape index: {}]   ;;  %s1440_s8 = inlined_call_operand.vmem [shape: f32[1,8], index: 8, kind: input, shape index: {}]   ;;  %s1441_s9 = inlined_call_operand.vmem [shape: f32[1,8], index: 9, kind: input, shape index: {}]   ;;  %s1442_s10 = inlined_call_operand.hbm [shape: f32[32,32], index: 10, kind: output, shape index: {}]  }
   0x1   :  { %v40_v0 = vld [vmem:[%s1433_s1] sm:$0xff]  ;;  %v37_v2 = vld [vmem:[%s1432_s0 + $0x8] sm:$0xff]  ;;  %257 = vst.msk [vmem:[#allocation3] sm:$0xff] %vm41_vm0, %v1125_v3  ;;  %258 = vst.msk [vmem:[#allocation3 + $0x8] sm:$0xff] %vm41_vm0, %v1125_v3 }
   0x2   :  { %v36_v1 = vld [vmem:[%s1432_s0] sm:$0xff]  ;;  %1040 = vmatprep.subr.mxu0 %v40_v0  ;;  %259 = vst.msk [vmem:[#allocation3 + $0x10] sm:$0xff] %vm41_vm0, %v1125_v3  ;;  %260 = vst.msk [vmem:[#allocation3 + $0x18] sm:$0xff] %vm41_vm0, %v1125_v3  ;;  %v38_v4 = vld [vmem:[%s1432_s0 + $0x10] sm:$0xff] }
   0x3   :  { %1042 = vmatprep.mubr.msk.f32.mxu0 %vm41_vm0, %v36_v1 }
   0x4   :  { %15 = vsyncpa [#allocation8], 0  ;;  %1041 = vmatpush3.msra.mxu0 %v40_v0  ;;  %263 = vst.msk [vmem:[#allocation3 + $0x1] sm:$0xff] %vm41_vm0, %v36_v1  ;;  %v39_v5 = vld [vmem:[%s1432_s0 + $0x18] sm:$0xff]  ;;  %vm509_vm2 = vcmask 31744   ;;  %v1126_v6 = vmov 0.0   ;;  %v185_v48 = vlaneseq }
   0x5   :  { %264 = vst.msk [vmem:[#allocation3 + $0x9] sm:$0xff] %vm41_vm0, %v37_v2  ;;  %275 = vst.msk [vmem:[#allocation3 + $0x13] sm:$0xff] %vm41_vm0, %v38_v4  ;;  %1043 = vmatmul.mubr.msk.f32.vlgmr.msra.gmra.mrb[0].mxu0 %vm41_vm0, %v37_v2  ;;  %vm141_vm3 = vcmask 130048   ;;  %v139_v50 = vld [vmem:[%s1434_s2] sm:$0x1]  ;;  %vm514_vm12 = vcmask 27648  }
   0x6   :  { %262 = vst.msk [vmem:[#allocation3 + $0x20] sm:$0xf] %vm261_vm1, %v1125_v3  ;;  %1045 = vmatprep.mubr.msk.f32.mxu0 %vm41_vm0, %v38_v4  ;;  %v186_v49 = vshrl.u32 %v185_v48, 7  ;;  %v140_v54 = vld [vmem:[%s1435_s3] sm:$0x1]  ;;  %s1127_s2 = smov 116  }
   0x7   :  { %276 = vst.msk [vmem:[#allocation3 + $0x1b] sm:$0xff] %vm41_vm0, %v39_v5  ;;  %s1128_s3 = smov 120   ;;  %s1130_s27 = smov 8   ;;  %vm583_vm13 = vcmask 64544   ;;  %vm596_vm14 = vcmask 97344   ;;  %vm609_vm15 = vcmask 130144  }
   0x8   :  { %516 = vst.msk [vmem:[#allocation5] sm:$0xff] %vm509_vm2, %v1126_v6  ;;  %517 = vst.msk [vmem:[#allocation5 + $0x8] sm:$0xff] %vm509_vm2, %v1126_v6  ;;  %v1249_v51 = vsub.s32 0, %v186_v49  ;;  %s1131_s28 = smov 12   ;;  %s1132_s29 = smov 16   ;;  %vm622_vm1 = vcmask 162944  }
   0x9   :  { %1046 = vmatmul.mubr.msk.f32.gmra.mrb[2].mxu0 %vm41_vm0, %v39_v5  ;;  %510 = vst.msk [vmem:[#allocation4] sm:$0xff] %vm509_vm2, %v1126_v6  ;;  %511 = vst.msk [vmem:[#allocation4 + $0x8] sm:$0xff] %vm509_vm2, %v1126_v6  ;;  %s1133_s30 = smov 20   ;;  %s1134_s15 = smov 24  }
   0xa   :  { %512 = vst.msk [vmem:[#allocation4 + $0x10] sm:$0xff] %vm509_vm2, %v1126_v6  ;;  %513 = vst.msk [vmem:[#allocation4 + $0x18] sm:$0xff] %vm509_vm2, %v1126_v6  ;;  %s1135_s19 = smov 28  }
   0xb   :  { %518 = vst.msk [vmem:[#allocation5 + $0x10] sm:$0xff] %vm509_vm2, %v1126_v6  ;;  %519 = vst.msk [vmem:[#allocation5 + $0x18] sm:$0xff] %vm509_vm2, %v1126_v6 }
   0xc   :  { %520 = vst.msk [vmem:[#allocation5 + $0x20] sm:$0xff] %vm509_vm2, %v1126_v6  ;;  %v277_v48 = vld [vmem:[#allocation3 + $0x12] sm:$0xff] }
   0xd   :  { %515 = vst.msk [vmem:[#allocation4 + $0x20] sm:$0xf] %vm514_vm12, %v1126_v6  ;;  %v287_v6 = vld [vmem:[%s1439_s7] sm:$0xff]  ;;  %v279_v49 = vld [vmem:[#allocation3 + $0x13] sm:$0xff]  ;;  %s1129_s7 = smov 4  }
   0xe   :  { %1048 = vmatprep.subr.mxu1 %v287_v6 }
   0xf   :  { %1049 = vmatpush3.msra.mxu1 %v287_v6 }
  0xd8   :  { %v1044_v7 = vpop.f32.mrb[0].mxu0 }
  0xd9   :  { %v143_v8 = vsel %vm141_vm3, %v1044_v7, 0.0  ;;  %v120_v9 = vpop.f32.mrb[1].mxu0 }
  0xda   :  { %v142_v10 = vsel %vm141_vm3, %v120_v9, 0.0 }
  0xdb   :  { %v144_v11 = vadd.f32 %v143_v8, %v142_v10 }
  0xdc   :  { %v1047_v12 = vpop.f32.mrb[2].mxu0 }
  0xdd   :  { %v130_v13 = vpop.f32.mrb[3].mxu0  ;;  %v147_v16 = vsel %vm141_vm3, %v1047_v12, 0.0 }
  0xde   :  { %v145_v14 = vsel %vm141_vm3, %v130_v13, 0.0 }
  0xdf   :  { %v146_v15 = vadd.f32 %v145_v14, %v144_v11 }
  0xe1   :  { %v148_v17 = vadd.f32 %v147_v16, %v146_v15 }
  0xe3   :  { %v149_v18 = vrot.slane %v148_v17, 4 }
  0xe5   :  { %v150_v19 = vadd.f32 %v149_v18, %v148_v17 }
  0xe7   :  { %v151_v20 = vrot.slane %v150_v19, 2 }
  0xe9   :  { %v152_v21 = vadd.f32 %v151_v20, %v150_v19 }
  0xeb   :  { %v153_v22 = vrot.slane %v152_v21, 1 }
  0xed   :  { %v154_v23 = vadd.f32 %v153_v22, %v152_v21 }
  0xef   :  { %v156_v24 = vmul.f32 0.03125, %v154_v23 }
  0xf1   :  { %v157_v25 = vsub.f32 %v120_v9, %v156_v24  ;;  %v158_v26 = vsub.f32 %v1044_v7, %v156_v24  ;;  %v159_v27 = vsub.f32 %v130_v13, %v156_v24  ;;  %v160_v28 = vsub.f32 %v1047_v12, %v156_v24 }
  0xf3   :  { %v161_v29 = vmul.f32 %v157_v25, %v157_v25  ;;  %v162_v30 = vmul.f32 %v158_v26, %v158_v26  ;;  %v163_v31 = vmul.f32 %v159_v27, %v159_v27  ;;  %v164_v32 = vmul.f32 %v160_v28, %v160_v28 }
  0xf5   :  { %v165_v33 = vsel %vm141_vm3, %v161_v29, 0.0  ;;  %v166_v34 = vsel %vm141_vm3, %v162_v30, 0.0  ;;  %v168_v36 = vsel %vm141_vm3, %v163_v31, 0.0  ;;  %v170_v38 = vsel %vm141_vm3, %v164_v32, 0.0 }
  0xf6   :  { %v167_v35 = vadd.f32 %v166_v34, %v165_v33 }
  0xf8   :  { %v169_v37 = vadd.f32 %v168_v36, %v167_v35 }
  0xfa   :  { %v171_v39 = vadd.f32 %v170_v38, %v169_v37 }
  0xfc   :  { %v172_v40 = vrot.slane %v171_v39, 4 }
  0xfe   :  { %v173_v41 = vadd.f32 %v172_v40, %v171_v39  ;;  %v265_v40 = vld [vmem:[#allocation3] sm:$0xff] }
 0x100   :  { %v174_v42 = vrot.slane %v173_v41, 2 }
 0x102   :  { %v175_v43 = vadd.f32 %v174_v42, %v173_v41  ;;  %v267_v41 = vld [vmem:[#allocation3 + $0x1] sm:$0xff] }
 0x103   :  { %v269_v42 = vld [vmem:[#allocation3 + $0x2] sm:$0xff] }
 0x104   :  { %v176_v44 = vrot.slane %v175_v43, 1 }
 0x106   :  { %v177_v45 = vadd.f32 %v176_v44, %v175_v43  ;;  %v271_v43 = vmax.f32 %v265_v40, %v267_v41  ;;  %v266_v44 = vld [vmem:[#allocation3 + $0x8] sm:$0xff] }
 0x108   :  { %v178_v46 = vmul.f32 0.03125, %v177_v45  ;;  %v268_v45 = vld [vmem:[#allocation3 + $0x9] sm:$0xff] }
 0x10a   :  { %v179_v47 = vadd.f32 1e-05, %v178_v46  ;;  %v270_v46 = vld [vmem:[#allocation3 + $0xa] sm:$0xff] }
 0x10c   :  { %1095 = vrsqrt.f32 %v179_v47  ;;  %v272_v47 = vmax.f32 %v266_v44, %v268_v45 }
 0x116   :  { %v1096_v52 = vpop.eup %1095 }
 0x117   :  { %v181_v53 = vmul.f32 %v1096_v52, %v139_v50  ;;  %v273_v50 = vmax.f32 %v271_v43, %v269_v42  ;;  %v281_v52 = vld [vmem:[#allocation3 + $0x14] sm:$0xff] }
 0x119   :  { %v182_v55 = vmul.f32 %v181_v53, %v156_v24  ;;  %v188_v56 = vrot.slane %v181_v53, %v1249_v51  ;;  %v283_v53 = vmax.f32 %v277_v48, %v279_v49  ;;  %1050 = vmatprep.mubr.msk.f32.mxu1 %vm41_vm0, %v273_v50 }
 0x11b   :  { %v183_v57 = vsub.f32 %v140_v54, %v182_v55  ;;  %v190_v58 = vmul.f32 %v188_v56, %v120_v9  ;;  %v191_v59 = vmul.f32 %v1044_v7, %v188_v56  ;;  %v192_v60 = vmul.f32 %v188_v56, %v130_v13  ;;  %v278_v54 = vld [vmem:[#allocation3 + $0x1a] sm:$0xff] }
 0x11c   :  { %v193_v61 = vmul.f32 %v1047_v12, %v188_v56  ;;  %v280_v55 = vld [vmem:[#allocation3 + $0x1b] sm:$0xff]  ;;  %v274_v56 = vmax.f32 %v272_v47, %v270_v46 }
 0x11d   :  { %v198_v62 = vrot.slane %v183_v57, %v1249_v51  ;;  %v282_v57 = vld [vmem:[#allocation3 + $0x1c] sm:$0xff] }
 0x11e   :  { %1051 = vmatmul.mubr.msk.f32.vlgmr.msra.gmra.mrb[0].mxu1 %vm41_vm0, %v274_v56 }
 0x11f   :  { %v200_v63 = vadd.f32 %v198_v62, %v190_v58  ;;  %v201_v0 = vadd.f32 %v198_v62, %v191_v59  ;;  %v202_v1 = vadd.f32 %v198_v62, %v192_v60  ;;  %v203_v2 = vadd.f32 %v198_v62, %v193_v61 }
 0x120   :  { %v284_v58 = vmax.f32 %v278_v54, %v280_v55  ;;  %v285_v59 = vmax.f32 %v283_v53, %v281_v52 }
 0x121   :  { %v220_v3 = vmul.f32 %v200_v63, %v200_v63  ;;  %vm206_vm4 = vcmp.le.f32.partialorder %v202_v1, -1.0  ;;  %v210_v4 = vadd.f32 0.33333334, %v202_v1  ;;  %v221_v5 = vmul.f32 %v201_v0, %v201_v0 }
 0x122   :  { %v222_v8 = vmul.f32 %v202_v1, %v202_v1  ;;  %v223_v10 = vmul.f32 %v203_v2, %v203_v2  ;;  %vm214_vm5 = vcmp.ge.f32.partialorder %v202_v1, 1.0  ;;  %v1002_v11 = vadd.f32 -0.33333334, %v200_v63  ;;  %1053 = vmatprep.mubr.msk.f32.mxu1 %vm41_vm0, %v285_v59 }
 0x123   :  { %v1003_v14 = vadd.f32 -0.33333334, %v201_v0  ;;  %v224_v15 = vadd.f32 3.0, %v220_v3  ;;  %v1004_v9 = vadd.f32 -0.33333334, %v202_v1  ;;  %v225_v7 = vadd.f32 3.0, %v221_v5 }
 0x124   :  { %v226_v13 = vadd.f32 3.0, %v222_v8  ;;  %v227_v12 = vadd.f32 3.0, %v223_v10  ;;  %v1005_v16 = vadd.f32 -0.33333334, %v203_v2  ;;  %vm204_vm6 = vcmp.le.f32.partialorder %v200_v63, -1.0 }
 0x125   :  { %v228_v17 = vmul.f32 %v224_v15, %v200_v63  ;;  %v208_v18 = vadd.f32 0.33333334, %v200_v63  ;;  %v229_v19 = vmul.f32 %v225_v7, %v201_v0  ;;  %vm212_vm7 = vcmp.ge.f32.partialorder %v200_v63, 1.0 }
 0x126   :  { %v230_v20 = vmul.f32 %v226_v13, %v202_v1  ;;  %v231_v21 = vmul.f32 %v227_v12, %v203_v2  ;;  %vm205_vm8 = vcmp.le.f32.partialorder %v201_v0, -1.0  ;;  %v209_v23 = vadd.f32 0.33333334, %v201_v0 }
 0x127   :  { %v233_v22 = vmul.f32 0.16666667, %v228_v17  ;;  %vm213_vm9 = vcmp.ge.f32.partialorder %v201_v0, 1.0  ;;  %v234_v24 = vmul.f32 0.16666667, %v229_v19  ;;  %vm207_vm10 = vcmp.le.f32.partialorder %v203_v2, -1.0 }
 0x128   :  { %v235_v25 = vmul.f32 0.16666667, %v230_v20  ;;  %v236_v26 = vmul.f32 0.16666667, %v231_v21  ;;  %v211_v28 = vadd.f32 0.33333334, %v203_v2  ;;  %v286_v60 = vmax.f32 %v284_v58, %v282_v57 }
 0x129   :  { %v237_v27 = vsel %vm212_vm7, %v1002_v11, %v233_v22  ;;  %vm215_vm11 = vcmp.ge.f32.partialorder %v203_v2, 1.0  ;;  %v238_v31 = vsel %vm213_vm9, %v1003_v14, %v234_v24 }
 0x12a   :  { %v239_v29 = vsel %vm214_vm5, %v1004_v9, %v235_v25  ;;  %v241_v30 = vsel %vm204_vm6, %v208_v18, %v237_v27  ;;  %v240_v32 = vsel %vm215_vm11, %v1005_v16, %v236_v26  ;;  %v242_v34 = vsel %vm205_vm8, %v209_v23, %v238_v31  ;;  %1054 = vmatmul.mubr.msk.f32.gmra.mrb[2].mxu1 %vm41_vm0, %v286_v60  ;;  %v756_v27 = vld [vmem:[%s1436_s4] sm:$0xff] }
 0x12b   :  { %v243_v33 = vsel %vm206_vm4, %v210_v4, %v239_v29  ;;  %245 = vst.msk [vmem:[#allocation2] sm:$0xff] %vm141_vm3, %v241_v30  ;;  %v244_v35 = vsel %vm207_vm10, %v211_v28, %v240_v32  ;;  %246 = vst.msk [vmem:[#allocation2 + $0x8] sm:$0xff] %vm141_vm3, %v242_v34  ;;  %v757_v28 = vld [vmem:[%s1436_s4 + $0x8] sm:$0xff]  ;;  %v758_v32 = vld [vmem:[%s1436_s4 + $0x10] sm:$0xff]  ;;  %vm648_vm4 = vcmask 228544   ;;  %vm661_vm5 = vcmask 261344  }
 0x12c   :  { %247 = vst.msk [vmem:[#allocation2 + $0x10] sm:$0xff] %vm141_vm3, %v243_v33  ;;  %248 = vst.msk [vmem:[#allocation2 + $0x18] sm:$0xff] %vm141_vm3, %v244_v35  ;;  %v1070_v29 = vpack.c.bf16 %v757_v28, %v756_v27  ;;  %v759_v33 = vld [vmem:[%s1436_s4 + $0x18] sm:$0xff]  ;;  %vm760_vm6 = vcmask 261120  }
 0x12d   :  { %v1074_v34 = vpack.c.bf16 %v759_v33, %v758_v32 }
 0x12e   :  { %1071 = vmatprep.subr.bf16.mxu0 %v1070_v29  ;;  %1078 = vmatprep.subr.bf16.mxu1 %v1070_v29 }
 0x12f   :  { %1073 = vmatpush3.bf16.msra.mxu0 %v1070_v29  ;;  %1080 = vmatpush3.bf16.msra.mxu1 %v1070_v29 }
 0x130   :  { %1075 = vmatprep.subr.bf16.mxu0 %v1074_v34  ;;  %1079 = vmatprep.subr.bf16.mxu1 %v1074_v34 }
 0x132   :  { %v533_v36 = vld [vmem:[#allocation2] sm:$0xff]  ;;  %v522_v38 = vld [vmem:[#allocation2 + $0x8] sm:$0xff] }
 0x133   :  { %537 = vrot.lane.b32.xlu1 %v533_v36, %s1127_s2  ;;  %525 = vrot.lane.b32.xlu0 %v533_v36, %s1128_s3  ;;  %v545_v37 = vld [vmem:[#allocation2 + $0x10] sm:$0xff]  ;;  %v546_v39 = vld [vmem:[#allocation2 + $0x18] sm:$0xff]  ;;  %253 = vst.msk [vmem:[#allocation7] sm:$0xff] %vm41_vm0, %v533_v36  ;;  %254 = vst.msk [vmem:[#allocation7 + $0x8] sm:$0xff] %vm41_vm0, %v522_v38 }
 0x134   :  { %256 = vst.msk [vmem:[#allocation7 + $0x18] sm:$0xff] %vm41_vm0, %v546_v39  ;;  %255 = vst.msk [vmem:[#allocation7 + $0x10] sm:$0xff] %vm41_vm0, %v545_v37  ;;  %1077 = vmatpush3.bf16.msra.mxu0 %v1074_v34  ;;  %1081 = vmatpush3.bf16.msra.mxu1 %v1074_v34 }
 0x137   :  { %549 = vrot.lane.b32.xlu1 %v545_v37, %s1128_s3  ;;  %527 = vrot.lane.b32.xlu0 %v522_v38, %s1128_s3 }
 0x13b   :  { %551 = vrot.lane.b32.xlu1 %v546_v39, %s1128_s3  ;;  %539 = vrot.lane.b32.xlu0 %v522_v38, %s1127_s2 }
 0x13f   :  { %563 = vrot.lane.b32.xlu1 %v546_v39, %s1127_s2  ;;  %561 = vrot.lane.b32.xlu0 %v545_v37, %s1127_s2 }
 0x1a5   :  { %v538_v61 = vpop.permute.xlu1 %537  ;;  %v526_v62 = vpop.permute.xlu0 %525 }
 0x1a6   :  { %543 = vst.msk [vmem:[#allocation5 + $0x2] sm:$0xff] %vm509_vm2, %v538_v61  ;;  %531 = vst.msk [vmem:[#allocation4 + $0x1] sm:$0xff] %vm509_vm2, %v526_v62 }
 0x1a9   :  { %v550_v63 = vpop.permute.xlu1 %549  ;;  %v528_v0 = vpop.permute.xlu0 %527 }
 0x1aa   :  { %555 = vst.msk [vmem:[#allocation4 + $0x13] sm:$0xff] %vm509_vm2, %v550_v63  ;;  %532 = vst.msk [vmem:[#allocation4 + $0x9] sm:$0xff] %vm509_vm2, %v528_v0 }
 0x1ad   :  { %v552_v1 = vpop.permute.xlu1 %551  ;;  %v540_v2 = vpop.permute.xlu0 %539  ;;  %v573_v3 = vld [vmem:[#allocation4 + $0x1] sm:$0xff]  ;;  %v612_v17 = vld [vmem:[#allocation5 + $0x1] sm:$0xff] }
 0x1ae   :  { %556 = vst.msk [vmem:[#allocation4 + $0x1b] sm:$0xff] %vm509_vm2, %v552_v1  ;;  %544 = vst.msk [vmem:[#allocation5 + $0xa] sm:$0xff] %vm509_vm2, %v540_v2  ;;  %577 = vrot.lane.b32.xlu0 %v573_v3, %s1129_s7  ;;  %v569_v4 = vld [vmem:[#allocation4] sm:$0xff]  ;;  %v599_v9 = vld [vmem:[#allocation5] sm:$0xff] }
 0x1af   :  { %571 = vst.msk [vmem:[#allocation6] sm:$0xff] %vm509_vm2, %v569_v4  ;;  %v625_v21 = vld [vmem:[#allocation5 + $0x2] sm:$0xff] }
 0x1b1   :  { %v564_v5 = vpop.permute.xlu1 %563  ;;  %v562_v8 = vpop.permute.xlu0 %561  ;;  %v586_v10 = vld [vmem:[#allocation4 + $0x2] sm:$0xff]  ;;  %v664_v15 = vld [vmem:[#allocation4 + $0x12] sm:$0xff]  ;;  %v587_v7 = vld [vmem:[#allocation4 + $0xa] sm:$0xff] }
 0x1b2   :  { %v574_v11 = vld [vmem:[#allocation4 + $0x9] sm:$0xff]  ;;  %568 = vst.msk [vmem:[#allocation5 + $0x1e] sm:$0xff] %vm509_vm2, %v564_v5  ;;  %567 = vst.msk [vmem:[#allocation5 + $0x16] sm:$0xff] %vm509_vm2, %v562_v8  ;;  %590 = vrot.lane.b32.xlu0 %v586_v10, %s1130_s27  ;;  %v668_v12 = vld [vmem:[#allocation4 + $0x13] sm:$0xff] }
 0x1b3   :  { %579 = vrot.lane.b32.xlu1 %v574_v11, %s1129_s7  ;;  %v570_v14 = vld [vmem:[#allocation4 + $0x8] sm:$0xff]  ;;  %666 = vst.msk [vmem:[#allocation6 + $0x10] sm:$0xff] %vm509_vm2, %v664_v15 }
 0x1b4   :  { %572 = vst.msk [vmem:[#allocation6 + $0x8] sm:$0xff] %vm509_vm2, %v570_v14 }
 0x1b5   :  { %v665_v13 = vld [vmem:[#allocation4 + $0x1a] sm:$0xff]  ;;  %v600_v16 = vld [vmem:[#allocation5 + $0x8] sm:$0xff] }
 0x1b6   :  { %603 = vrot.lane.b32.xlu0 %v599_v9, %s1131_s28  ;;  %667 = vst.msk [vmem:[#allocation6 + $0x18] sm:$0xff] %vm509_vm2, %v665_v13  ;;  %v669_v18 = vld [vmem:[#allocation4 + $0x1b] sm:$0xff]  ;;  %v613_v20 = vld [vmem:[#allocation5 + $0x9] sm:$0xff]  ;;  %vm635_vm2 = vcmask 195744  }
 0x1b7   :  { %592 = vrot.lane.b32.xlu1 %v587_v7, %s1130_s27  ;;  %v680_v19 = vld [vmem:[#allocation4 + $0x14] sm:$0xff]  ;;  %v681_v22 = vld [vmem:[#allocation4 + $0x1c] sm:$0xff]  ;;  %v638_v25 = vld [vmem:[#allocation5 + $0x3] sm:$0xff] }
 0x1b8   :  { %v626_v23 = vld [vmem:[#allocation5 + $0xa] sm:$0xff] }
 0x1b9   :  { %v692_v24 = vld [vmem:[#allocation5 + $0x14] sm:$0xff]  ;;  %v693_v26 = vld [vmem:[#allocation5 + $0x1c] sm:$0xff]  ;;  %v639_v30 = vld [vmem:[#allocation5 + $0xb] sm:$0xff] }
 0x1ba   :  { %605 = vrot.lane.b32.xlu0 %v600_v16, %s1131_s28  ;;  %v704_v31 = vld [vmem:[#allocation5 + $0x15] sm:$0xff]  ;;  %v705_v35 = vld [vmem:[#allocation5 + $0x1d] sm:$0xff]  ;;  %v652_v37 = vld [vmem:[#allocation5 + $0xc] sm:$0xff] }
 0x1bb   :  { %672 = vrot.lane.b32.xlu1 %v668_v12, %s1129_s7  ;;  %v651_v36 = vld [vmem:[#allocation5 + $0x4] sm:$0xff]  ;;  %v716_v38 = vld [vmem:[#allocation5 + $0x16] sm:$0xff] }
 0x1bc   :  { %v728_v39 = vld [vmem:[#allocation5 + $0x17] sm:$0xff]  ;;  %v729_v41 = vld [vmem:[#allocation5 + $0x1f] sm:$0xff] }
 0x1bd   :  { %v717_v6 = vld [vmem:[#allocation5 + $0x1e] sm:$0xff] }
 0x1be   :  { %674 = vrot.lane.b32.xlu0 %v669_v18, %s1129_s7  ;;  %v740_v40 = vld [vmem:[#allocation5 + $0x18] sm:$0xff]  ;;  %v741_v42 = vld [vmem:[#allocation5 + $0x20] sm:$0xff] }
 0x1bf   :  { %616 = vrot.lane.b32.xlu1 %v612_v17, %s1132_s29 }
 0x1c2   :  { %618 = vrot.lane.b32.xlu0 %v613_v20, %s1132_s29 }
 0x1c3   :  { %684 = vrot.lane.b32.xlu1 %v680_v19, %s1130_s27 }
 0x1c6   :  { %686 = vrot.lane.b32.xlu0 %v681_v22, %s1130_s27 }
 0x1c7   :  { %629 = vrot.lane.b32.xlu1 %v625_v21, %s1133_s30 }
 0x1ca   :  { %631 = vrot.lane.b32.xlu0 %v626_v23, %s1133_s30 }
 0x1cb   :  { %696 = vrot.lane.b32.xlu1 %v692_v24, %s1131_s28 }
 0x1ce   :  { %698 = vrot.lane.b32.xlu0 %v693_v26, %s1131_s28 }
 0x1cf   :  { %642 = vrot.lane.b32.xlu1 %v638_v25, %s1134_s15 }
 0x1d2   :  { %644 = vrot.lane.b32.xlu0 %v639_v30, %s1134_s15 }
 0x1d3   :  { %708 = vrot.lane.b32.xlu1 %v704_v31, %s1132_s29 }
 0x1d6   :  { %710 = vrot.lane.b32.xlu0 %v705_v35, %s1132_s29 }
 0x1d7   :  { %655 = vrot.lane.b32.xlu1 %v651_v36, %s1135_s19 }
 0x1da   :  { %657 = vrot.lane.b32.xlu0 %v652_v37, %s1135_s19 }
 0x1db   :  { %720 = vrot.lane.b32.xlu1 %v716_v38, %s1133_s30 }
 0x1de   :  { %732 = vrot.lane.b32.xlu0 %v728_v39, %s1134_s15 }
 0x1df   :  { %722 = vrot.lane.b32.xlu1 %v717_v6, %s1133_s30 }
 0x1e2   :  { %744 = vrot.lane.b32.xlu0 %v740_v40, %s1135_s19 }
 0x1e3   :  { %734 = vrot.lane.b32.xlu1 %v729_v41, %s1134_s15 }
 0x1e7   :  { %746 = vrot.lane.b32.xlu1 %v741_v42, %s1135_s19 }
 0x1f1   :  { %v1339_v59 = vpop.f32.mrb[0].mxu1 }
 0x1f2   :  { %v388_v62 = vsel %vm41_vm0, %v1339_v59, 0.0  ;;  %v1345_v63 = vpop.f32.mrb[1].mxu1 }
 0x1f3   :  { %v387_v0 = vsel %vm41_vm0, %v1345_v63, 0.0 }
 0x1f4   :  { %v389_v1 = vadd.f32 %v388_v62, %v387_v0 }
 0x1fd   :  { %v1349_v2 = vpop.f32.mrb[2].mxu1 }
 0x1fe   :  { %v1353_v5 = vpop.f32.mrb[3].mxu1  ;;  %v392_v8 = vsel %vm41_vm0, %v1349_v2, 0.0 }
 0x1ff   :  { %v390_v10 = vsel %vm41_vm0, %v1353_v5, 0.0 }
 0x200   :  { %v391_v11 = vadd.f32 %v390_v10, %v389_v1 }
 0x202   :  { %v393_v9 = vadd.f32 %v392_v8, %v391_v11 }
 0x204   :  { %v394_v7 = vrot.slane %v393_v9, 4 }
 0x206   :  { %v395_v16 = vadd.f32 %v394_v7, %v393_v9 }
 0x208   :  { %v396_v17 = vrot.slane %v395_v16, 2 }
 0x20a   :  { %v397_v21 = vadd.f32 %v396_v17, %v395_v16 }
 0x20c   :  { %v398_v22 = vrot.slane %v397_v21, 1 }
 0x20e   :  { %v399_v26 = vadd.f32 %v398_v22, %v397_v21 }
 0x210   :  { %v400_v27 = vmul.f32 0.03125, %v399_v26 }
 0x212   :  { %v401_v29 = vsub.f32 %v1345_v63, %v400_v27  ;;  %v402_v30 = vsub.f32 %v1339_v59, %v400_v27  ;;  %v403_v31 = vsub.f32 %v1353_v5, %v400_v27  ;;  %v404_v32 = vsub.f32 %v1349_v2, %v400_v27 }
 0x214   :  { %v405_v33 = vmul.f32 %v401_v29, %v401_v29  ;;  %v406_v34 = vmul.f32 %v402_v30, %v402_v30  ;;  %v407_v35 = vmul.f32 %v403_v31, %v403_v31  ;;  %v408_v36 = vmul.f32 %v404_v32, %v404_v32 }
 0x216   :  { %v409_v38 = vsel %vm41_vm0, %v405_v33, 0.0  ;;  %v410_v39 = vsel %vm41_vm0, %v406_v34, 0.0  ;;  %v412_v6 = vsel %vm41_vm0, %v407_v35, 0.0  ;;  %v414_v41 = vsel %vm41_vm0, %v408_v36, 0.0 }
 0x217   :  { %v411_v40 = vadd.f32 %v410_v39, %v409_v38 }
 0x220   :  { %v578_v43 = vpop.permute.xlu0 %577 }
 0x221   :  { %584 = vst.msk [vmem:[#allocation6] sm:$0xff] %vm583_vm13, %v578_v43  ;;  %v413_v43 = vadd.f32 %v412_v6, %v411_v40 }
 0x224   :  { %v591_v45 = vpop.permute.xlu0 %590 }
 0x225   :  { %v580_v44 = vpop.permute.xlu1 %579  ;;  %597 = vst.msk [vmem:[#allocation6] sm:$0xff] %vm596_vm14, %v591_v45 }
 0x226   :  { %585 = vst.msk [vmem:[#allocation6 + $0x8] sm:$0xff] %vm583_vm13, %v580_v44  ;;  %v415_v44 = vadd.f32 %v414_v41, %v413_v43 }
 0x228   :  { %v604_v47 = vpop.permute.xlu0 %603  ;;  %v416_v45 = vrot.slane %v415_v44, 4 }
 0x229   :  { %v593_v46 = vpop.permute.xlu1 %592  ;;  %610 = vst.msk [vmem:[#allocation6] sm:$0xff] %vm609_vm15, %v604_v47 }
 0x22a   :  { %598 = vst.msk [vmem:[#allocation6 + $0x8] sm:$0xff] %vm596_vm14, %v593_v46  ;;  %v417_v46 = vadd.f32 %v416_v45, %v415_v44 }
 0x22c   :  { %v606_v49 = vpop.permute.xlu0 %605  ;;  %v418_v47 = vrot.slane %v417_v46, 2 }
 0x22d   :  { %v673_v48 = vpop.permute.xlu1 %672  ;;  %611 = vst.msk [vmem:[#allocation6 + $0x8] sm:$0xff] %vm609_vm15, %v606_v49 }
 0x22e   :  { %678 = vst.msk [vmem:[#allocation6 + $0x10] sm:$0xff] %vm583_vm13, %v673_v48  ;;  %v419_v48 = vadd.f32 %v418_v47, %v417_v46 }
 0x230   :  { %v675_v52 = vpop.permute.xlu0 %674  ;;  %v420_v49 = vrot.slane %v419_v48, 1 }
 0x231   :  { %v617_v50 = vpop.permute.xlu1 %616  ;;  %679 = vst.msk [vmem:[#allocation6 + $0x18] sm:$0xff] %vm583_vm13, %v675_v52 }
 0x232   :  { %623 = vst.msk [vmem:[#allocation6] sm:$0xff] %vm622_vm1, %v617_v50  ;;  %v421_v50 = vadd.f32 %v420_v49, %v419_v48 }
 0x234   :  { %v619_v54 = vpop.permute.xlu0 %618  ;;  %v422_v52 = vmul.f32 0.03125, %v421_v50 }
 0x235   :  { %v685_v53 = vpop.permute.xlu1 %684  ;;  %624 = vst.msk [vmem:[#allocation6 + $0x8] sm:$0xff] %vm622_vm1, %v619_v54  ;;  %v385_v54 = vld [vmem:[%s1440_s8] sm:$0x1] }
 0x236   :  { %690 = vst.msk [vmem:[#allocation6 + $0x10] sm:$0xff] %vm596_vm14, %v685_v53  ;;  %v423_v53 = vadd.f32 1e-05, %v422_v52 }
 0x238   :  { %v687_v56 = vpop.permute.xlu0 %686  ;;  %1097 = vrsqrt.f32 %v423_v53 }
 0x239   :  { %v630_v55 = vpop.permute.xlu1 %629  ;;  %691 = vst.msk [vmem:[#allocation6 + $0x18] sm:$0xff] %vm596_vm14, %v687_v56  ;;  %vm504_vm14 = vcmask 261312  }
 0x23a   :  { %636 = vst.msk [vmem:[#allocation6] sm:$0xff] %vm635_vm2, %v630_v55 }
 0x23c   :  { %v632_v58 = vpop.permute.xlu0 %631 }
 0x23d   :  { %v697_v57 = vpop.permute.xlu1 %696  ;;  %637 = vst.msk [vmem:[#allocation6 + $0x8] sm:$0xff] %vm635_vm2, %v632_v58 }
 0x23e   :  { %702 = vst.msk [vmem:[#allocation6 + $0x10] sm:$0xff] %vm609_vm15, %v697_v57  ;;  %v386_v57 = vld [vmem:[%s1441_s9] sm:$0x1] }
 0x240   :  { %v699_v61 = vpop.permute.xlu0 %698 }
 0x241   :  { %v643_v60 = vpop.permute.xlu1 %642  ;;  %703 = vst.msk [vmem:[#allocation6 + $0x18] sm:$0xff] %vm609_vm15, %v699_v61 }
 0x242   :  { %649 = vst.msk [vmem:[#allocation6] sm:$0xff] %vm648_vm4, %v643_v60  ;;  %v1098_v55 = vpop.eup %1097 }
 0x243   :  { %v425_v56 = vmul.f32 %v1098_v55, %v385_v54 }
 0x244   :  { %v645_v4 = vpop.permute.xlu0 %644 }
 0x245   :  { %v709_v3 = vpop.permute.xlu1 %708  ;;  %650 = vst.msk [vmem:[#allocation6 + $0x8] sm:$0xff] %vm648_vm4, %v645_v4  ;;  %v426_v58 = vmul.f32 %v425_v56, %v400_v27  ;;  %v432_v60 = vrot.slane %v425_v56, %v1249_v51 }
 0x246   :  { %714 = vst.msk [vmem:[#allocation6 + $0x10] sm:$0xff] %vm622_vm1, %v709_v3 }
 0x247   :  { %v427_v61 = vsub.f32 %v386_v57, %v426_v58  ;;  %v434_v62 = vmul.f32 %v432_v60, %v1345_v63  ;;  %v435_v0 = vmul.f32 %v1339_v59, %v432_v60  ;;  %v436_v1 = vmul.f32 %v432_v60, %v1353_v5 }
 0x248   :  { %v711_v15 = vpop.permute.xlu0 %710  ;;  %v437_v3 = vmul.f32 %v1349_v2, %v432_v60 }
 0x249   :  { %v656_v14 = vpop.permute.xlu1 %655  ;;  %715 = vst.msk [vmem:[#allocation6 + $0x18] sm:$0xff] %vm622_vm1, %v711_v15  ;;  %v442_v4 = vrot.slane %v427_v61, %v1249_v51 }
 0x24a   :  { %662 = vst.msk [vmem:[#allocation6] sm:$0xff] %vm661_vm5, %v656_v14 }
 0x24b   :  { %v444_v8 = vadd.f32 %v442_v4, %v434_v62  ;;  %v445_v10 = vadd.f32 %v442_v4, %v435_v0  ;;  %v446_v11 = vadd.f32 %v442_v4, %v436_v1  ;;  %v447_v14 = vadd.f32 %v442_v4, %v437_v3 }
 0x24c   :  { %v658_v12 = vpop.permute.xlu0 %657 }
 0x24d   :  { %v721_v13 = vpop.permute.xlu1 %720  ;;  %663 = vst.msk [vmem:[#allocation6 + $0x8] sm:$0xff] %vm661_vm5, %v658_v12  ;;  %v464_v15 = vmul.f32 %v444_v8, %v444_v8  ;;  %v465_v9 = vmul.f32 %v445_v10, %v445_v10  ;;  %vm448_vm0 = vcmp.le.f32.partialorder %v444_v8, -1.0  ;;  %v452_v12 = vadd.f32 0.33333334, %v444_v8 }
 0x24e   :  { %726 = vst.msk [vmem:[#allocation6 + $0x10] sm:$0xff] %vm635_vm2, %v721_v13  ;;  %v1010_v16 = vadd.f32 -0.33333334, %v444_v8  ;;  %v466_v17 = vmul.f32 %v446_v11, %v446_v11  ;;  %vm456_vm7 = vcmp.ge.f32.partialorder %v444_v8, 1.0  ;;  %v453_v59 = vadd.f32 0.33333334, %v445_v10 }
 0x24f   :  { %v468_v7 = vadd.f32 3.0, %v464_v15  ;;  %v469_v13 = vadd.f32 3.0, %v465_v9  ;;  %v1011_v5 = vadd.f32 -0.33333334, %v445_v10  ;;  %vm457_vm8 = vcmp.ge.f32.partialorder %v445_v10, 1.0 }
 0x250   :  { %v733_v19 = vpop.permute.xlu0 %732  ;;  %vm449_vm9 = vcmp.le.f32.partialorder %v445_v10, -1.0  ;;  %vm450_vm10 = vcmp.le.f32.partialorder %v446_v11, -1.0  ;;  %vm458_vm11 = vcmp.ge.f32.partialorder %v446_v11, 1.0  ;;  %v1013_v31 = vadd.f32 -0.33333334, %v447_v14 }
 0x251   :  { %v723_v18 = vpop.permute.xlu1 %722  ;;  %v752_v20 = vld [vmem:[#allocation6] sm:$0xff]  ;;  %738 = vst.msk [vmem:[#allocation6 + $0x10] sm:$0xff] %vm648_vm4, %v733_v19  ;;  %v472_v63 = vmul.f32 %v468_v7, %v444_v8  ;;  %v470_v19 = vadd.f32 3.0, %v466_v17  ;;  %v455_v33 = vadd.f32 0.33333334, %v447_v14  ;;  %vm459_vm12 = vcmp.ge.f32.partialorder %v447_v14, 1.0 }
 0x252   :  { %727 = vst.msk [vmem:[#allocation6 + $0x18] sm:$0xff] %vm635_vm2, %v723_v18  ;;  %1064 = vmatprep.mubr.msk.f32.mxu0 %vm760_vm6, %v752_v20  ;;  %v473_v18 = vmul.f32 %v469_v13, %v445_v10  ;;  %v467_v20 = vmul.f32 %v447_v14, %v447_v14  ;;  %vm451_vm13 = vcmp.le.f32.partialorder %v447_v14, -1.0 }
 0x253   :  { %v476_v2 = vmul.f32 0.16666667, %v472_v63 }
 0x254   :  { %v745_v24 = vpop.permute.xlu0 %744  ;;  %v753_v25 = vld [vmem:[#allocation6 + $0x8] sm:$0xff]  ;;  %v477_v21 = vmul.f32 0.16666667, %v473_v18 }
 0x255   :  { %v735_v23 = vpop.permute.xlu1 %734  ;;  %750 = vst.msk [vmem:[#allocation6 + $0x10] sm:$0xff] %vm661_vm5, %v745_v24  ;;  %1065 = vmatmul.mubr.msk.f32.vlgmr.msra.gmra.mrb[4].mxu0 %vm760_vm6, %v753_v25  ;;  %v480_v22 = vsel %vm456_vm7, %v1010_v16, %v476_v2  ;;  %v474_v24 = vmul.f32 %v470_v19, %v446_v11  ;;  %v471_v25 = vadd.f32 3.0, %v467_v20  ;;  %vm977_vm7 = vcmask 195648  }
 0x256   :  { %739 = vst.msk [vmem:[#allocation6 + $0x18] sm:$0xff] %vm648_vm4, %v735_v23  ;;  %v1012_v23 = vadd.f32 -0.33333334, %v446_v11  ;;  %v484_v26 = vsel %vm448_vm0, %v452_v12, %v480_v22  ;;  %v481_v27 = vsel %vm457_vm8, %v1011_v5, %v477_v21  ;;  %v858_v21 = vld [vmem:[%s1437_s5] sm:$0x1]  ;;  %s1136_s5 = smov [#allocation7]  }
 0x257   :  { %492 = vrot.lane.b32.xlu0 %v484_v26, %s1134_s15  ;;  %v485_v29 = vsel %vm449_vm9, %v453_v59, %v481_v27  ;;  %v478_v30 = vmul.f32 0.16666667, %v474_v24  ;;  %v475_v32 = vmul.f32 %v471_v25, %v447_v14  ;;  %v859_v24 = vld [vmem:[%s1438_s6] sm:$0x1]  ;;  %s987_s6 = sshll.u32 %s1136_s5, 4  ;;  %s988_s6 = int_to_ptr.vmem [resolvable:$true] %s987_s6 }
 0x258   :  { %494 = vrot.lane.b32.xlu1 %v485_v29, %s1134_s15  ;;  %s1101_s24 = scalar_lea.vmem %s988_s6, 512  ;;  %p1106_p1 = scmp.lt.s32.totalorder %s988_s6, %s988_s6 }
 0x259   :  { %v747_v28 = vpop.permute.xlu1 %746  ;;  %v482_v34 = vsel %vm458_vm11, %v1012_v23, %v478_v30  ;;  %v479_v35 = vmul.f32 0.16666667, %v475_v32  ;;  %p1102_p0 = scmp.ne.s32.totalorder %s988_s6, %s1101_s24  ;;  %p1107_p2 = scmp.lt.s32.totalorder %s1101_s24, %s1101_s24 }
 0x25a   :  { %751 = vst.msk [vmem:[#allocation6 + $0x18] sm:$0xff] %vm661_vm5, %v747_v28  ;;  %v454_v28 = vadd.f32 0.33333334, %v446_v11 }
 0x25b   :  { %p1108_p3 = por %p1107_p2, %p1106_p1 }
 0x25c   :  { %v754_v37 = vld [vmem:[#allocation6 + $0x10] sm:$0xff]  ;;  %v486_v36 = vsel %vm450_vm10, %v454_v28, %v482_v34 }
 0x25d   :  { %1067 = vmatprep.mubr.msk.f32.mxu1 %vm760_vm6, %v754_v37  ;;  %496 = vrot.lane.b32.xlu0 %v486_v36, %s1134_s15  ;;  %v483_v37 = vsel %vm459_vm12, %v1013_v31, %v479_v35  ;;  %p1109_p4 = pnand %p1108_p3, %p1102_p0 }
 0x25e   :  { %v487_v38 = vsel %vm451_vm13, %v455_v33, %v483_v37 }
 0x25f   :  { %498 = vrot.lane.b32.xlu1 %v487_v38, %s1134_s15 }
 0x261   :  { %v755_v42 = vld [vmem:[#allocation6 + $0x18] sm:$0xff] }
 0x262   :  { %1068 = vmatmul.mubr.msk.f32.vlgmr.msra.gmra.mrb[4].mxu1 %vm760_vm6, %v755_v42 }
 0x2c9   :  { %v493_v39 = vpop.permute.xlu0 %492 }
 0x2ca   :  { %v495_v6 = vpop.permute.xlu1 %494  ;;  %505 = vst.msk [vmem:[#allocation7] sm:$0xff] %vm504_vm14, %v493_v39 }
 0x2cb   :  { %506 = vst.msk [vmem:[#allocation7 + $0x8] sm:$0xff] %vm504_vm14, %v495_v6 }
 0x2cf   :  { %v497_v44 = vpop.permute.xlu0 %496 }
 0x2d0   :  { %507 = vst.msk [vmem:[#allocation7 + $0x10] sm:$0xff] %vm504_vm14, %v497_v44 }
 0x2d1   :  { %v499_v46 = vpop.permute.xlu1 %498 }
 0x2d2   :  { %508 = vst.msk [vmem:[#allocation7 + $0x18] sm:$0xff] %vm504_vm14, %v499_v46 }
 0x328   :  { %v1066_v40 = vpop.f32.mrb[4].mxu0 }
 0x329   :  { %v861_v41 = vsel %vm141_vm3, %v1066_v40, 0.0  ;;  %v839_v42 = vpop.f32.mrb[5].mxu0 }
 0x32a   :  { %v860_v43 = vsel %vm141_vm3, %v839_v42, 0.0 }
 0x32b   :  { %v862_v45 = vadd.f32 %v861_v41, %v860_v43 }
 0x335   :  { %v1069_v47 = vpop.f32.mrb[4].mxu1 }
 0x336   :  { %v849_v48 = vpop.f32.mrb[5].mxu1  ;;  %v865_v52 = vsel %vm141_vm3, %v1069_v47, 0.0 }
 0x337   :  { %v863_v49 = vsel %vm141_vm3, %v849_v48, 0.0 }
 0x338   :  { %v864_v50 = vadd.f32 %v863_v49, %v862_v45 }
 0x33a   :  { %v866_v53 = vadd.f32 %v865_v52, %v864_v50 }
 0x33c   :  { %v867_v54 = vrot.slane %v866_v53, 4 }
 0x33e   :  { %v868_v55 = vadd.f32 %v867_v54, %v866_v53 }
 0x340   :  { %v869_v56 = vrot.slane %v868_v55, 2 }
 0x342   :  { %v870_v57 = vadd.f32 %v869_v56, %v868_v55 }
 0x344   :  { %v871_v58 = vrot.slane %v870_v57, 1 }
 0x346   :  { %v872_v60 = vadd.f32 %v871_v58, %v870_v57 }
 0x348   :  { %v873_v61 = vmul.f32 0.03125, %v872_v60 }
 0x34a   :  { %v874_v62 = vsub.f32 %v839_v42, %v873_v61  ;;  %v875_v0 = vsub.f32 %v1066_v40, %v873_v61  ;;  %v876_v1 = vsub.f32 %v849_v48, %v873_v61  ;;  %v877_v3 = vsub.f32 %v1069_v47, %v873_v61 }
 0x34c   :  { %v878_v4 = vmul.f32 %v874_v62, %v874_v62  ;;  %v879_v8 = vmul.f32 %v875_v0, %v875_v0  ;;  %v880_v10 = vmul.f32 %v876_v1, %v876_v1  ;;  %v881_v11 = vmul.f32 %v877_v3, %v877_v3 }
 0x34e   :  { %v882_v14 = vsel %vm141_vm3, %v878_v4, 0.0  ;;  %v883_v15 = vsel %vm141_vm3, %v879_v8, 0.0  ;;  %v885_v7 = vsel %vm141_vm3, %v880_v10, 0.0  ;;  %v887_v12 = vsel %vm141_vm3, %v881_v11, 0.0 }
 0x34f   :  { %v884_v9 = vadd.f32 %v883_v15, %v882_v14 }
 0x351   :  { %v886_v13 = vadd.f32 %v885_v7, %v884_v9 }
 0x353   :  { %v888_v16 = vadd.f32 %v887_v12, %v886_v13 }
 0x355   :  { %v889_v63 = vrot.slane %v888_v16, 4 }
 0x357   :  { %v890_v17 = vadd.f32 %v889_v63, %v888_v16 }
 0x359   :  { %v891_v59 = vrot.slane %v890_v17, 2 }
 0x35b   :  { %v892_v5 = vadd.f32 %v891_v59, %v890_v17 }
 0x35d   :  { %v893_v18 = vrot.slane %v892_v5, 1 }
 0x35f   :  { %v894_v2 = vadd.f32 %v893_v18, %v892_v5 }
 0x361   :  { %v895_v19 = vmul.f32 0.03125, %v894_v2 }
 0x363   :  { %v896_v20 = vadd.f32 1e-05, %v895_v19 }
 0x365   :  { %1099 = vrsqrt.f32 %v896_v20 }
 0x36f   :  { %v1100_v22 = vpop.eup %1099 }
 0x370   :  { %v898_v23 = vmul.f32 %v1100_v22, %v858_v21 }
 0x372   :  { %v899_v25 = vmul.f32 %v898_v23, %v873_v61  ;;  %v905_v26 = vrot.slane %v898_v23, %v1249_v51 }
 0x374   :  { %v900_v27 = vsub.f32 %v859_v24, %v899_v25  ;;  %v907_v28 = vmul.f32 %v905_v26, %v839_v42  ;;  %v908_v29 = vmul.f32 %v1066_v40, %v905_v26  ;;  %v909_v30 = vmul.f32 %v905_v26, %v849_v48 }
 0x375   :  { %v910_v31 = vmul.f32 %v1069_v47, %v905_v26 }
 0x376   :  { %v915_v32 = vrot.slane %v900_v27, %v1249_v51 }
 0x378   :  { %v917_v33 = vadd.f32 %v915_v32, %v907_v28  ;;  %v918_v34 = vadd.f32 %v915_v32, %v908_v29  ;;  %v919_v35 = vadd.f32 %v915_v32, %v909_v30  ;;  %v920_v36 = vadd.f32 %v915_v32, %v910_v31 }
 0x37a   :  { %v938_v37 = vmul.f32 %v918_v34, %v918_v34  ;;  %v937_v38 = vmul.f32 %v917_v33, %v917_v33  ;;  %v940_v6 = vmul.f32 %v920_v36, %v920_v36  ;;  %v939_v45 = vmul.f32 %v919_v35, %v919_v35 }
 0x37b   :  { %vm922_vm3 = vcmp.le.f32.partialorder %v918_v34, -1.0  ;;  %v926_v46 = vadd.f32 0.33333334, %v918_v34  ;;  %v1019_v42 = vadd.f32 -0.33333334, %v918_v34  ;;  %vm930_vm15 = vcmp.ge.f32.partialorder %v918_v34, 1.0 }
 0x37c   :  { %v942_v39 = vadd.f32 3.0, %v938_v37  ;;  %v941_v41 = vadd.f32 3.0, %v937_v38  ;;  %v944_v44 = vadd.f32 3.0, %v940_v6  ;;  %v925_v47 = vadd.f32 0.33333334, %v917_v33 }
 0x37d   :  { %v943_v51 = vadd.f32 3.0, %v939_v45  ;;  %vm929_vm1 = vcmp.ge.f32.partialorder %v917_v33, 1.0  ;;  %v1018_v50 = vadd.f32 -0.33333334, %v917_v33  ;;  %v1021_v54 = vadd.f32 -0.33333334, %v920_v36 }
 0x37e   :  { %v946_v43 = vmul.f32 %v942_v39, %v918_v34  ;;  %v945_v40 = vmul.f32 %v941_v41, %v917_v33  ;;  %v948_v49 = vmul.f32 %v944_v44, %v920_v36  ;;  %vm921_vm2 = vcmp.le.f32.partialorder %v917_v33, -1.0 }
 0x37f   :  { %v947_v56 = vmul.f32 %v943_v51, %v919_v35  ;;  %vm932_vm4 = vcmp.ge.f32.partialorder %v920_v36, 1.0  ;;  %v1020_v62 = vadd.f32 -0.33333334, %v919_v35  ;;  %v928_v1 = vadd.f32 0.33333334, %v920_v36 }
 0x380   :  { %v950_v48 = vmul.f32 0.16666667, %v946_v43  ;;  %v949_v52 = vmul.f32 0.16666667, %v945_v40  ;;  %v952_v55 = vmul.f32 0.16666667, %v948_v49 }
 0x381   :  { %v951_v0 = vmul.f32 0.16666667, %v947_v56  ;;  %vm931_vm5 = vcmp.ge.f32.partialorder %v919_v35, 1.0  ;;  %vm924_vm6 = vcmp.le.f32.partialorder %v920_v36, -1.0  ;;  %v927_v3 = vadd.f32 0.33333334, %v919_v35 }
 0x382   :  { %v954_v53 = vsel %vm930_vm15, %v1019_v42, %v950_v48  ;;  %v953_v58 = vsel %vm929_vm1, %v1018_v50, %v949_v52  ;;  %v956_v61 = vsel %vm932_vm4, %v1021_v54, %v952_v55  ;;  %vm923_vm0 = vcmp.le.f32.partialorder %v919_v35, -1.0 }
 0x383   :  { %v958_v57 = vsel %vm922_vm3, %v926_v46, %v954_v53  ;;  %v957_v60 = vsel %vm921_vm2, %v925_v47, %v953_v58  ;;  %v955_v4 = vsel %vm931_vm5, %v1020_v62, %v951_v0  ;;  %v960_v8 = vsel %vm924_vm6, %v928_v1, %v956_v61 }
 0x384   :  { %967 = vrot.lane.b32.xlu1 %v958_v57, %s1130_s27  ;;  %965 = vrot.lane.b32.xlu0 %v957_v60, %s1130_s27  ;;  %v959_v10 = vsel %vm923_vm0, %v927_v3, %v955_v4 }
 0x388   :  { %971 = vrot.lane.b32.xlu1 %v960_v8, %s1130_s27  ;;  %969 = vrot.lane.b32.xlu0 %v959_v10, %s1130_s27 }
 0x3f6   :  { %v968_v11 = vpop.permute.xlu1 %967  ;;  %v966_v14 = vpop.permute.xlu0 %965 }
 0x3f7   :  { %979 = vst.msk [vmem:[#allocation7 + $0x8] sm:$0xff] %vm977_vm7, %v968_v11  ;;  %978 = vst.msk [vmem:[#allocation7] sm:$0xff] %vm977_vm7, %v966_v14 }
 0x3fa   :  { %v972_v15 = vpop.permute.xlu1 %971  ;;  %v970_v9 = vpop.permute.xlu0 %969 }
 0x3fb   :  { %981 = vst.msk [vmem:[#allocation7 + $0x18] sm:$0xff] %vm977_vm7, %v972_v15  ;;  %980 = vst.msk [vmem:[#allocation7 + $0x10] sm:$0xff] %vm977_vm7, %v970_v9 }
 0x3fc   :  { %1112 = shalt.err (!%p1109_p4)
}
 0x3fd   :  { %s1113_s25 = scalar_lea.hbm %s1442_s10, 512 }
 0x3fe   :  { %p1114_p5 = scmp.ne.s32.totalorder %s1442_s10, %s1113_s25  ;;  %p1117_p6 = scmp.lt.u32.totalorder %s1113_s25, %s1442_s10 }
 0x400   :  { %p1119_p7 = pnand %p1117_p6, %p1114_p5 }
 0x402   :  { %1122 = shalt.err (!%p1119_p7)
}
 0x403   :  { %s1137_s30 = smov 128  }
 0x404   :  { %993 = dma.vmem_to_hbm [thread:$0]  %s988_s6, 512, %s1442_s10, [#allocation8], %s1137_s30, %s1137_s30, %s1130_s27  }
 0x405   :  { %1123 = dma.done.wait [#allocation8], 512  }
 0x406   :  { %1124 = vsyncadd [#allocation8], 4294966784 }
 0x407   :  { %997 = vsyncpa [#allocation8], 1 }

</bundles_post_ra>
